<compile_context>
chip_gen: v5e
topology: v5e:2x2
jax: 0.10.0
libtpu: 0.0.40
codegen_flags: <defaults>
</compile_context>

<pallas_src>
import functools

import jax
import jax.numpy as jnp
from jax.experimental import pallas as pl
from jax.experimental.pallas import tpu as pltpu


def _round_up(x, m):
    return ((x + m - 1) // m) * m


# -----------------------------------------------------------------------------
# Chunked multi-layer GRU kernel (bias=False, PyTorch gate order [r, z, n])
# -----------------------------------------------------------------------------
def _gru_chunk_kernel(n_layers, chunk_t, hp, *refs):
    """One (batch-group, time-chunk) grid step of the fused GRU.

    Inputs:
      fidx_ref : (Bg, 1)      int32  last valid timestep per row (-1 = all pad)
      x_ref    : (tc*Bg, F)   f32    this chunk's layer-0 input rows
      wih0_ref : (F,  3*hp)   bf16   layer-0 input weights, lane-aligned gates
      whh0_ref : (hp, 3*hp)   bf16   layer-0 hidden weights
      wcat[l]  : (2*hp,4*hp)  bf16   fused [ih|hh] weights of layer l+1
    Output:
      out_ref  : (Bg, hp)     f32    top-layer hidden at the selected step
    Scratch (persist across grid steps):
      gi0_ref  : (tc*Bg,3*hp) f32    hoisted layer-0 projection for this chunk
      h_ref    : (L, Bg, hp)  f32    per-layer hidden carry across chunks
    """
    fidx_ref = refs[0]
    x_ref = refs[1]
    wih0_ref = refs[2]
    whh0_ref = refs[3]
    wcat = refs[4:4 + (n_layers - 1)]
    out_ref = refs[4 + (n_layers - 1)]
    gi0_ref, h_ref = refs[5 + (n_layers - 1):]

    bg = fidx_ref.shape[0]
    c = pl.program_id(1)          # time-chunk index (innermost, "arbitrary")

    @pl.when(c == 0)
    def _():
        h_ref[...] = jnp.zeros_like(h_ref)
        out_ref[...] = jnp.zeros_like(out_ref)

    # Hoisted layer-0 input projection for the whole chunk: one big bf16
    # matmul instead of chunk_t tiny per-step matmuls on the serial chain.
    gi0_ref[...] = jnp.dot(x_ref[...].astype(jnp.bfloat16), wih0_ref[...],
                           preferred_element_type=jnp.float32)

    fidx = fidx_ref[...]          # (Bg, 1) int32
    t0 = c * chunk_t

    # Hidden states + output accumulator live in the loop carry (vregs):
    # no per-step VMEM read-modify-write.
    carry0 = (tuple(h_ref[l] for l in range(n_layers)), out_ref[...])

    def step(i, carry):
        hs, out_acc = carry
        row = pl.multiple_of(i * bg, 8)
        gi = gi0_ref[pl.ds(row, bg), :]            # (Bg, 3*hp) f32
        hs_new = []
        layer_in = None
        for l in range(n_layers):
            h_prev = hs[l]
            if l == 0:
                gh = jnp.dot(h_prev.astype(jnp.bfloat16), whh0_ref[...],
                             preferred_element_type=jnp.float32)
                r = jax.nn.sigmoid(gi[:, 0 * hp:1 * hp] + gh[:, 0 * hp:1 * hp])
                z = jax.nn.sigmoid(gi[:, 1 * hp:2 * hp] + gh[:, 1 * hp:2 * hp])
                n = jnp.tanh(gi[:, 2 * hp:3 * hp] + r * gh[:, 2 * hp:3 * hp])
            else:
                xh = jnp.concatenate([layer_in.astype(jnp.bfloat16),
                                      h_prev.astype(jnp.bfloat16)], axis=1)
                g = jnp.dot(xh, wcat[l - 1][...],
                            preferred_element_type=jnp.float32)
                r = jax.nn.sigmoid(g[:, 0 * hp:1 * hp])
                z = jax.nn.sigmoid(g[:, 1 * hp:2 * hp])
                n = jnp.tanh(g[:, 2 * hp:3 * hp] + r * g[:, 3 * hp:4 * hp])
            h_new = n + z * (h_prev - n)           # == (1-z)*n + z*h_prev
            hs_new.append(h_new)
            layer_in = h_new
        out_acc = jnp.where(fidx == t0 + i, layer_in, out_acc)
        return tuple(hs_new), out_acc

    hs_fin, out_fin = jax.lax.fori_loop(
        0, chunk_t, step, carry0,
        unroll=(chunk_t if chunk_t <= 8 else 4))   # bounded unroll

    for l in range(n_layers):
        h_ref[l] = hs_fin[l]
    out_ref[...] = out_fin


# -----------------------------------------------------------------------------
# Full module forward
# -----------------------------------------------------------------------------
def seq_encoder_gru_forward(params, f, padding, *, time_chunk=32,
                            batch_groups=1):
    """Reproduces Seq_Encoder_GRU.forward.

    f:       (T, B, in_dim) float32
    padding: (B, T) float32 or None  (trailing-only padding masks assumed,
             same as the PyTorch module / final_index formula)
    returns  (B, out_dim) float32

    batch_groups=2 splits the batch across v7x's two TensorCores.
    """
    w_ih_list = params["w_ih"]
    w_hh_list = params["w_hh"]
    n_layers = len(w_ih_list)
    T, B, F = f.shape
    H = w_hh_list[0].shape[1]
    hp = _round_up(max(H, 128), 128)             # lane-aligned gate slab width

    n_groups = max(1, int(batch_groups))
    bg = _round_up(-(-B // n_groups), 8)         # sublane-aligned rows / group
    b_pad = bg * n_groups

    tc = max(1, min(int(time_chunk), T))         # timesteps per chunk
    t_pad = _round_up(T, tc)
    n_chunks = t_pad // tc

    # ---- layer-0 input: feature-UNPADDED, (group, time, batch, feat) order --
    x = jnp.zeros((t_pad, b_pad, F), jnp.float32).at[:T, :B, :].set(f)
    x = x.reshape(t_pad, n_groups, bg, F).transpose(1, 0, 2, 3)
    x = x.reshape(n_groups * t_pad * bg, F)      # row-block = one (g, chunk)

    if padding is None:
        final_index = jnp.full((B,), T - 1, jnp.int32)
    else:
        final_index = (T - jnp.sum(padding, axis=1) - 1).astype(jnp.int32)
    fidx = jnp.full((b_pad,), -1, jnp.int32).at[:B].set(final_index)
    fidx = fidx.reshape(b_pad, 1)

    # ---- weights: lane-aligned gate slabs, cast once to bf16 ----------------
    def gate_cols(w, rows):
        wt = jnp.transpose(w)                    # (Fin, 3H)
        out = jnp.zeros((rows, 3 * hp), jnp.float32)
        for g in range(3):
            out = out.at[:wt.shape[0], g * hp:g * hp + H].set(
                wt[:, g * H:(g + 1) * H])
        return out

    wih0 = gate_cols(w_ih_list[0], F).astype(jnp.bfloat16)       # (F, 3*hp)
    whh0 = gate_cols(w_hh_list[0], hp).astype(jnp.bfloat16)      # (hp, 3*hp)

    def fused_w(w_ih, w_hh):
        wi = jnp.transpose(w_ih)                 # (H, 3H)
        wh = jnp.transpose(w_hh)                 # (H, 3H)
        out = jnp.zeros((2 * hp, 4 * hp), jnp.float32)
        for g in range(2):                       # r, z: summed ih+hh slabs
            out = out.at[:H, g * hp:g * hp + H].set(wi[:, g * H:(g + 1) * H])
            out = out.at[hp:hp + H, g * hp:g * hp + H].set(
                wh[:, g * H:(g + 1) * H])
        # n contributions stay separate: n = tanh(gi_n + r * gh_n)
        out = out.at[:H, 2 * hp:2 * hp + H].set(wi[:, 2 * H:3 * H])
        out = out.at[hp:hp + H, 3 * hp:3 * hp + H].set(wh[:, 2 * H:3 * H])
        return out.astype(jnp.bfloat16)

    wcat = [fused_w(w_ih_list[l], w_hh_list[l]) for l in range(1, n_layers)]

    # ---- VMEM budget: double-buffered blocks + scratch ----------------------
    # TODO(synk): store gi0 scratch in bf16 for very large chunks on v7x.
    blk_bytes = (bg * 4 + tc * bg * F * 4 + bg * hp * 4
                 + wih0.size * 2 + whh0.size * 2
                 + sum(w.size * 2 for w in wcat))
    scratch_bytes = tc * bg * 3 * hp * 4 + n_layers * bg * hp * 4
    est = 2 * blk_bytes + scratch_bytes
    vmem_limit = int(min(max(2 * est + (8 << 20), 32 << 20), 96 << 20))

    kernel = functools.partial(_gru_chunk_kernel, n_layers, tc, hp)

    def const_spec(shape):
        return pl.BlockSpec(shape, lambda g, c: (0,) * len(shape))

    out_pad = pl.pallas_call(
        kernel,
        out_shape=jax.ShapeDtypeStruct((b_pad, hp), jnp.float32),
        grid=(n_groups, n_chunks),
        in_specs=[
            pl.BlockSpec((bg, 1), lambda g, c: (g, 0)),
            pl.BlockSpec((tc * bg, F), lambda g, c: (g * n_chunks + c, 0)),
            const_spec(wih0.shape),
            const_spec(whh0.shape),
            *[const_spec(w.shape) for w in wcat],
        ],
        out_specs=pl.BlockSpec((bg, hp), lambda g, c: (g, 0)),
        scratch_shapes=[
            pltpu.VMEM((tc * bg, 3 * hp), jnp.float32),    # per-chunk gi0
            pltpu.VMEM((n_layers, bg, hp), jnp.float32),   # hidden carry
        ],
        compiler_params=pltpu.CompilerParams(
            dimension_semantics=("parallel", "arbitrary"),
            vmem_limit_bytes=vmem_limit),
    )(fidx, x, wih0, whh0, *wcat)

    out = out_pad[:B, :H]
    if padding is None:
        return out
    return jnp.where((final_index == -1)[:, None],
                     params["padding_weight"][None, :], out)


# -----------------------------------------------------------------------------
# Pure-JAX f32 reference for correctness checking
# -----------------------------------------------------------------------------
def _gru_layer_ref(x, w_ih, w_hh):
    H = w_hh.shape[1]
    B = x.shape[1]

    def step(h, x_t):
        gi = x_t @ w_ih.T
        gh = h @ w_hh.T
        r = jax.nn.sigmoid(gi[:, :H] + gh[:, :H])
        z = jax.nn.sigmoid(gi[:, H:2 * H] + gh[:, H:2 * H])
        n = jnp.tanh(gi[:, 2 * H:] + r * gh[:, 2 * H:])
        h_new = (1.0 - z) * n + z * h
        return h_new, h_new

    _, ys = jax.lax.scan(step, jnp.zeros((B, H), jnp.float32), x)
    return ys


def _forward_ref(params, f, padding):
    h = f
    for wih, whh in zip(params["w_ih"], params["w_hh"]):
        h = _gru_layer_ref(h, wih, whh)
    if padding is None:
        return h[-1]
    T = padding.shape[1]
    final_index = (T - jnp.sum(padding, axis=1) - 1).astype(jnp.int32)
    f_bt = jnp.transpose(h, (1, 0, 2))
    safe_idx = jnp.clip(final_index, 0, T - 1)
    gathered = jnp.take_along_axis(f_bt, safe_idx[:, None, None], axis=1)[:, 0, :]
    return jnp.where((final_index == -1)[:, None],
                     params["padding_weight"][None, :], gathered)


# -----------------------------------------------------------------------------
# Deterministic parameter init (nn.GRU(in_dim, out_dim, layer, bias=False))
# -----------------------------------------------------------------------------
def init_params(key, in_dim, out_dim, n_layers):
    keys = jax.random.split(key, 2 * n_layers + 1)
    scale = 1.0 / jnp.sqrt(out_dim)
    w_ih, w_hh = [], []
    for l in range(n_layers):
        f_in = in_dim if l == 0 else out_dim
        w_ih.append(jax.random.uniform(
            keys[2 * l], (3 * out_dim, f_in), jnp.float32, -scale, scale))
        w_hh.append(jax.random.uniform(
            keys[2 * l + 1], (3 * out_dim, out_dim), jnp.float32, -scale, scale))
    padding_weight = jax.random.uniform(
        keys[-1], (out_dim,), jnp.float32, -1.0, 1.0)
    # NOTE: self.predictor (nn.Linear(out_dim, 1)) is unused in forward().
    return {"w_ih": w_ih, "w_hh": w_hh, "padding_weight": padding_weight}


# -----------------------------------------------------------------------------
if __name__ == "__main__":
    T, B = 8, 10
    in_dim, out_dim, n_layers = 16, 32, 2

    key = jax.random.PRNGKey(0)
    k_params, k_f = jax.random.split(key)

    params = init_params(k_params, in_dim, out_dim, n_layers)
    f = jax.random.normal(k_f, (T, B, in_dim), jnp.float32)

    # padding: (B, T). Row b has pad_counts[b] trailing padded steps; row 5 is
    # fully padded to exercise the padding_weight branch (final_index == -1).
    pad_counts = jnp.array([0, 1, 2, 3, 4, T, 6, 7, 2, 0], dtype=jnp.int32)
    t_idx = jnp.arange(T)[None, :]
    padding = (t_idx >= (T - pad_counts)[:, None]).astype(jnp.float32)

    # time_chunk=4 -> 2 time-chunks; batch_groups=2 -> 2 batch groups (padded
    # to 16 rows), exercising the full grid / carried-state path.
    fwd = jax.jit(functools.partial(
        seq_encoder_gru_forward, params, time_chunk=4, batch_groups=2))
    out = jax.block_until_ready(fwd(f, padding))

    ref = _forward_ref(params, f, padding)
    assert out.shape == (B, out_dim)
    # bf16 MXU operands with f32 accumulation -> loosened tolerance vs f32 ref.
    assert jnp.allclose(out, ref, atol=3e-2, rtol=3e-2), "mismatch vs reference"

    # Also exercise the padding==None path (returns last timestep output).
    out_none = jax.block_until_ready(fwd(f, None))
    ref_none = _forward_ref(params, f, None)
    assert jnp.allclose(out_none, ref_none, atol=3e-2, rtol=3e-2)

    print("KERNEL_OK")
</pallas_src>

<mosaic_0001>
module attributes {stable_mosaic.version = 11 : i64} {
  func.func @_gru_chunk_kernel(%arg0: i32, %arg1: i32, %arg2: memref<8x1xi32, #tpu.memory_space<vmem>>, %arg3: memref<32x16xf32, #tpu.memory_space<vmem>>, %arg4: memref<16x384xbf16, #tpu.memory_space<vmem>>, %arg5: memref<128x384xbf16, #tpu.memory_space<vmem>>, %arg6: memref<256x512xbf16, #tpu.memory_space<vmem>>, %arg7: memref<8x128xf32, #tpu.memory_space<vmem>>, %arg8: memref<32x384xf32, #tpu.memory_space<vmem>>, %arg9: memref<2x8x128xf32, #tpu.memory_space<vmem>>) attributes {dimension_semantics = [#tpu.dimension_semantics<parallel>, #tpu.dimension_semantics<arbitrary>], iteration_bounds = array<i64: 2, 2>, scalar_prefetch = 0 : i64, scratch_operands = 2 : i64, tpu.core_type = #tpu.core_type<tc>, window_params = [{transform_indices = @transform_0, window_bounds = array<i64: 8, 1>}, {transform_indices = @transform_1, window_bounds = array<i64: 32, 16>}, {pipeline_mode = #tpu.pipeline_mode<synchronous>, transform_indices = @transform_2, window_bounds = array<i64: 16, 384>}, {pipeline_mode = #tpu.pipeline_mode<synchronous>, transform_indices = @transform_3, window_bounds = array<i64: 128, 384>}, {pipeline_mode = #tpu.pipeline_mode<synchronous>, transform_indices = @transform_4, window_bounds = array<i64: 256, 512>}, {transform_indices = @transform_5, window_bounds = array<i64: 8, 128>}]} {
    %c0_i32 = arith.constant 0 : i32
    %0 = arith.cmpi eq, %arg1, %c0_i32 : i32
    %1 = arith.extui %0 : i1 to i32
    %c0_i32_0 = arith.constant 0 : i32
    %2 = arith.cmpi ne, %1, %c0_i32_0 : i32
    scf.if %2 {
      %cst_72 = arith.constant 0.000000e+00 : f32
      %270 = vector.broadcast %cst_72 : f32 to vector<2x8x128xf32>
      %c0_73 = arith.constant 0 : index
      %c0_74 = arith.constant 0 : index
      %c0_75 = arith.constant 0 : index
      %271 = vector.load %arg9[%c0_73, %c0_74, %c0_75] : memref<2x8x128xf32, #tpu.memory_space<vmem>>, vector<2x8x128xf32>
      tpu.vector_store %arg9[%c0_73, %c0_74, %c0_75], %270 {strides = array<i32>} : memref<2x8x128xf32, #tpu.memory_space<vmem>>, vector<2x8x128xf32>,
      %cst_76 = arith.constant 0.000000e+00 : f32
      %272 = vector.broadcast %cst_76 : f32 to vector<8x128xf32>
      %c0_77 = arith.constant 0 : index
      %c0_78 = arith.constant 0 : index
      %273 = vector.load %arg7[%c0_77, %c0_78] : memref<8x128xf32, #tpu.memory_space<vmem>>, vector<8x128xf32>
      tpu.vector_store %arg7[%c0_77, %c0_78], %272 {strides = array<i32>} : memref<8x128xf32, #tpu.memory_space<vmem>>, vector<8x128xf32>,
    } else {
    }
    %c0 = arith.constant 0 : index
    %c0_1 = arith.constant 0 : index
    %3 = vector.load %arg3[%c0, %c0_1] : memref<32x16xf32, #tpu.memory_space<vmem>>, vector<32x16xf32>
    %4 = arith.truncf %3 : vector<32x16xf32> to vector<32x16xbf16>
    %c0_2 = arith.constant 0 : index
    %c0_3 = arith.constant 0 : index
    %5 = vector.load %arg4[%c0_2, %c0_3] : memref<16x384xbf16, #tpu.memory_space<vmem>>, vector<16x384xbf16>
    %cst = arith.constant dense<0.000000e+00> : vector<32x384xf32>
    %6 = tpu.matmul %4, %5, %cst {dimension_numbers = #tpu.dot_dimension_numbers<[1], [0], [0], [1], [0, 0, 1, 1], [], []>} : vector<32x16xbf16>, vector<16x384xbf16>, vector<32x384xf32> -> vector<32x384xf32>
    %c0_4 = arith.constant 0 : index
    %c0_5 = arith.constant 0 : index
    %7 = vector.load %arg8[%c0_4, %c0_5] : memref<32x384xf32, #tpu.memory_space<vmem>>, vector<32x384xf32>
    tpu.vector_store %arg8[%c0_4, %c0_5], %6 {strides = array<i32>} : memref<32x384xf32, #tpu.memory_space<vmem>>, vector<32x384xf32>,
    %c0_6 = arith.constant 0 : index
    %c0_7 = arith.constant 0 : index
    %8 = vector.load %arg2[%c0_6, %c0_7] : memref<8x1xi32, #tpu.memory_space<vmem>>, vector<8x1xi32>
    %c4_i32 = arith.constant 4 : i32
    %9 = arith.muli %arg1, %c4_i32 : i32
    %c0_8 = arith.constant 0 : index
    %c0_9 = arith.constant 0 : index
    %c0_10 = arith.constant 0 : index
    %10 = vector.load %arg9[%c0_8, %c0_9, %c0_10] : memref<2x8x128xf32, #tpu.memory_space<vmem>>, vector<1x8x128xf32>
    %11 = vector.shape_cast %10 : vector<1x8x128xf32> to vector<8x128xf32>
    %c1 = arith.constant 1 : index
    %c0_11 = arith.constant 0 : index
    %c0_12 = arith.constant 0 : index
    %12 = vector.load %arg9[%c1, %c0_11, %c0_12] : memref<2x8x128xf32, #tpu.memory_space<vmem>>, vector<1x8x128xf32>
    %13 = vector.shape_cast %12 : vector<1x8x128xf32> to vector<8x128xf32>
    %c0_13 = arith.constant 0 : index
    %c0_14 = arith.constant 0 : index
    %14 = vector.load %arg7[%c0_13, %c0_14] : memref<8x128xf32, #tpu.memory_space<vmem>>, vector<8x128xf32>
    %c0_i32_15 = arith.constant 0 : i32
    %c8_i32 = arith.constant 8 : i32
    %15 = arith.muli %c0_i32_15, %c8_i32 : i32
    %16 = tpu.assume_multiple %15, 8 : i32
    %17 = arith.index_cast %16 : i32 to index
    %c0_16 = arith.constant 0 : index
    %18 = vector.load %arg8[%17, %c0_16] : memref<32x384xf32, #tpu.memory_space<vmem>>, vector<8x384xf32>
    %19 = arith.truncf %11 : vector<8x128xf32> to vector<8x128xbf16>
    %c0_17 = arith.constant 0 : index
    %c0_18 = arith.constant 0 : index
    %20 = vector.load %arg5[%c0_17, %c0_18] : memref<128x384xbf16, #tpu.memory_space<vmem>>, vector<128x384xbf16>
    %cst_19 = arith.constant dense<0.000000e+00> : vector<8x384xf32>
    %21 = tpu.matmul %19, %20, %cst_19 {dimension_numbers = #tpu.dot_dimension_numbers<[1], [0], [0], [1], [0, 0, 1, 1], [], []>} : vector<8x128xbf16>, vector<128x384xbf16>, vector<8x384xf32> -> vector<8x384xf32>
    %22 = vector.extract_strided_slice %18 {offsets = [0, 0], sizes = [8, 128], strides = [1, 1]} : vector<8x384xf32> to vector<8x128xf32>
    %23 = vector.extract_strided_slice %21 {offsets = [0, 0], sizes = [8, 128], strides = [1, 1]} : vector<8x384xf32> to vector<8x128xf32>
    %24 = arith.addf %22, %23 : vector<8x128xf32>
    %25 = arith.negf %24 : vector<8x128xf32>
    %26 = math.exp %25 : vector<8x128xf32>
    %cst_20 = arith.constant 1.000000e+00 : f32
    %27 = vector.broadcast %cst_20 : f32 to vector<8x128xf32>
    %28 = arith.addf %27, %26 : vector<8x128xf32>
    %29 = arith.divf %27, %28 : vector<8x128xf32>
    %30 = vector.extract_strided_slice %18 {offsets = [0, 128], sizes = [8, 128], strides = [1, 1]} : vector<8x384xf32> to vector<8x128xf32>
    %31 = vector.extract_strided_slice %21 {offsets = [0, 128], sizes = [8, 128], strides = [1, 1]} : vector<8x384xf32> to vector<8x128xf32>
    %32 = arith.addf %30, %31 : vector<8x128xf32>
    %33 = arith.negf %32 : vector<8x128xf32>
    %34 = math.exp %33 : vector<8x128xf32>
    %cst_21 = arith.constant 1.000000e+00 : f32
    %35 = vector.broadcast %cst_21 : f32 to vector<8x128xf32>
    %36 = arith.addf %35, %34 : vector<8x128xf32>
    %37 = arith.divf %35, %36 : vector<8x128xf32>
    %38 = vector.extract_strided_slice %18 {offsets = [0, 256], sizes = [8, 128], strides = [1, 1]} : vector<8x384xf32> to vector<8x128xf32>
    %39 = vector.extract_strided_slice %21 {offsets = [0, 256], sizes = [8, 128], strides = [1, 1]} : vector<8x384xf32> to vector<8x128xf32>
    %40 = arith.mulf %29, %39 : vector<8x128xf32>
    %41 = arith.addf %38, %40 : vector<8x128xf32>
    %42 = math.tanh %41 : vector<8x128xf32>
    %43 = arith.subf %11, %42 : vector<8x128xf32>
    %44 = arith.mulf %37, %43 : vector<8x128xf32>
    %45 = arith.addf %42, %44 : vector<8x128xf32>
    %46 = arith.truncf %45 : vector<8x128xf32> to vector<8x128xbf16>
    %47 = arith.truncf %13 : vector<8x128xf32> to vector<8x128xbf16>
    %48 = tpu.concatenate %46, %47 in 1 : vector<8x128xbf16>, vector<8x128xbf16> -> vector<8x256xbf16>
    %c0_22 = arith.constant 0 : index
    %c0_23 = arith.constant 0 : index
    %49 = vector.load %arg6[%c0_22, %c0_23] : memref<256x512xbf16, #tpu.memory_space<vmem>>, vector<256x512xbf16>
    %cst_24 = arith.constant dense<0.000000e+00> : vector<8x512xf32>
    %50 = tpu.matmul %48, %49, %cst_24 {dimension_numbers = #tpu.dot_dimension_numbers<[1], [0], [0], [1], [0, 0, 1, 1], [], []>} : vector<8x256xbf16>, vector<256x512xbf16>, vector<8x512xf32> -> vector<8x512xf32>
    %51 = vector.extract_strided_slice %50 {offsets = [0, 0], sizes = [8, 128], strides = [1, 1]} : vector<8x512xf32> to vector<8x128xf32>
    %52 = arith.negf %51 : vector<8x128xf32>
    %53 = math.exp %52 : vector<8x128xf32>
    %cst_25 = arith.constant 1.000000e+00 : f32
    %54 = vector.broadcast %cst_25 : f32 to vector<8x128xf32>
    %55 = arith.addf %54, %53 : vector<8x128xf32>
    %56 = arith.divf %54, %55 : vector<8x128xf32>
    %57 = vector.extract_strided_slice %50 {offsets = [0, 128], sizes = [8, 128], strides = [1, 1]} : vector<8x512xf32> to vector<8x128xf32>
    %58 = arith.negf %57 : vector<8x128xf32>
    %59 = math.exp %58 : vector<8x128xf32>
    %cst_26 = arith.constant 1.000000e+00 : f32
    %60 = vector.broadcast %cst_26 : f32 to vector<8x128xf32>
    %61 = arith.addf %60, %59 : vector<8x128xf32>
    %62 = arith.divf %60, %61 : vector<8x128xf32>
    %63 = vector.extract_strided_slice %50 {offsets = [0, 256], sizes = [8, 128], strides = [1, 1]} : vector<8x512xf32> to vector<8x128xf32>
    %64 = vector.extract_strided_slice %50 {offsets = [0, 384], sizes = [8, 128], strides = [1, 1]} : vector<8x512xf32> to vector<8x128xf32>
    %65 = arith.mulf %56, %64 : vector<8x128xf32>
    %66 = arith.addf %63, %65 : vector<8x128xf32>
    %67 = math.tanh %66 : vector<8x128xf32>
    %68 = arith.subf %13, %67 : vector<8x128xf32>
    %69 = arith.mulf %62, %68 : vector<8x128xf32>
    %70 = arith.addf %67, %69 : vector<8x128xf32>
    %71 = arith.addi %9, %c0_i32_15 : i32
    %72 = vector.broadcast %71 : i32 to vector<8x1xi32>
    %73 = arith.cmpi eq, %8, %72 : vector<8x1xi32>
    %74 = vector.shape_cast %73 : vector<8x1xi1> to vector<8x1xi1>
    %75 = vector.broadcast %74 : vector<8x1xi1> to vector<8x128xi1>
    %76 = arith.select %75, %70, %14 : vector<8x128xi1>, vector<8x128xf32>
    %c1_i32 = arith.constant 1 : i32
    %c8_i32_27 = arith.constant 8 : i32
    %77 = arith.muli %c1_i32, %c8_i32_27 : i32
    %78 = tpu.assume_multiple %77, 8 : i32
    %79 = arith.index_cast %78 : i32 to index
    %c0_28 = arith.constant 0 : index
    %80 = vector.load %arg8[%79, %c0_28] : memref<32x384xf32, #tpu.memory_space<vmem>>, vector<8x384xf32>
    %81 = arith.truncf %45 : vector<8x128xf32> to vector<8x128xbf16>
    %c0_29 = arith.constant 0 : index
    %c0_30 = arith.constant 0 : index
    %82 = vector.load %arg5[%c0_29, %c0_30] : memref<128x384xbf16, #tpu.memory_space<vmem>>, vector<128x384xbf16>
    %cst_31 = arith.constant dense<0.000000e+00> : vector<8x384xf32>
    %83 = tpu.matmul %81, %82, %cst_31 {dimension_numbers = #tpu.dot_dimension_numbers<[1], [0], [0], [1], [0, 0, 1, 1], [], []>} : vector<8x128xbf16>, vector<128x384xbf16>, vector<8x384xf32> -> vector<8x384xf32>
    %84 = vector.extract_strided_slice %80 {offsets = [0, 0], sizes = [8, 128], strides = [1, 1]} : vector<8x384xf32> to vector<8x128xf32>
    %85 = vector.extract_strided_slice %83 {offsets = [0, 0], sizes = [8, 128], strides = [1, 1]} : vector<8x384xf32> to vector<8x128xf32>
    %86 = arith.addf %84, %85 : vector<8x128xf32>
    %87 = arith.negf %86 : vector<8x128xf32>
    %88 = math.exp %87 : vector<8x128xf32>
    %cst_32 = arith.constant 1.000000e+00 : f32
    %89 = vector.broadcast %cst_32 : f32 to vector<8x128xf32>
    %90 = arith.addf %89, %88 : vector<8x128xf32>
    %91 = arith.divf %89, %90 : vector<8x128xf32>
    %92 = vector.extract_strided_slice %80 {offsets = [0, 128], sizes = [8, 128], strides = [1, 1]} : vector<8x384xf32> to vector<8x128xf32>
    %93 = vector.extract_strided_slice %83 {offsets = [0, 128], sizes = [8, 128], strides = [1, 1]} : vector<8x384xf32> to vector<8x128xf32>
    %94 = arith.addf %92, %93 : vector<8x128xf32>
    %95 = arith.negf %94 : vector<8x128xf32>
    %96 = math.exp %95 : vector<8x128xf32>
    %cst_33 = arith.constant 1.000000e+00 : f32
    %97 = vector.broadcast %cst_33 : f32 to vector<8x128xf32>
    %98 = arith.addf %97, %96 : vector<8x128xf32>
    %99 = arith.divf %97, %98 : vector<8x128xf32>
    %100 = vector.extract_strided_slice %80 {offsets = [0, 256], sizes = [8, 128], strides = [1, 1]} : vector<8x384xf32> to vector<8x128xf32>
    %101 = vector.extract_strided_slice %83 {offsets = [0, 256], sizes = [8, 128], strides = [1, 1]} : vector<8x384xf32> to vector<8x128xf32>
    %102 = arith.mulf %91, %101 : vector<8x128xf32>
    %103 = arith.addf %100, %102 : vector<8x128xf32>
    %104 = math.tanh %103 : vector<8x128xf32>
    %105 = arith.subf %45, %104 : vector<8x128xf32>
    %106 = arith.mulf %99, %105 : vector<8x128xf32>
    %107 = arith.addf %104, %106 : vector<8x128xf32>
    %108 = arith.truncf %107 : vector<8x128xf32> to vector<8x128xbf16>
    %109 = arith.truncf %70 : vector<8x128xf32> to vector<8x128xbf16>
    %110 = tpu.concatenate %108, %109 in 1 : vector<8x128xbf16>, vector<8x128xbf16> -> vector<8x256xbf16>
    %c0_34 = arith.constant 0 : index
    %c0_35 = arith.constant 0 : index
    %111 = vector.load %arg6[%c0_34, %c0_35] : memref<256x512xbf16, #tpu.memory_space<vmem>>, vector<256x512xbf16>
    %cst_36 = arith.constant dense<0.000000e+00> : vector<8x512xf32>
    %112 = tpu.matmul %110, %111, %cst_36 {dimension_numbers = #tpu.dot_dimension_numbers<[1], [0], [0], [1], [0, 0, 1, 1], [], []>} : vector<8x256xbf16>, vector<256x512xbf16>, vector<8x512xf32> -> vector<8x512xf32>
    %113 = vector.extract_strided_slice %112 {offsets = [0, 0], sizes = [8, 128], strides = [1, 1]} : vector<8x512xf32> to vector<8x128xf32>
    %114 = arith.negf %113 : vector<8x128xf32>
    %115 = math.exp %114 : vector<8x128xf32>
    %cst_37 = arith.constant 1.000000e+00 : f32
    %116 = vector.broadcast %cst_37 : f32 to vector<8x128xf32>
    %117 = arith.addf %116, %115 : vector<8x128xf32>
    %118 = arith.divf %116, %117 : vector<8x128xf32>
    %119 = vector.extract_strided_slice %112 {offsets = [0, 128], sizes = [8, 128], strides = [1, 1]} : vector<8x512xf32> to vector<8x128xf32>
    %120 = arith.negf %119 : vector<8x128xf32>
    %121 = math.exp %120 : vector<8x128xf32>
    %cst_38 = arith.constant 1.000000e+00 : f32
    %122 = vector.broadcast %cst_38 : f32 to vector<8x128xf32>
    %123 = arith.addf %122, %121 : vector<8x128xf32>
    %124 = arith.divf %122, %123 : vector<8x128xf32>
    %125 = vector.extract_strided_slice %112 {offsets = [0, 256], sizes = [8, 128], strides = [1, 1]} : vector<8x512xf32> to vector<8x128xf32>
    %126 = vector.extract_strided_slice %112 {offsets = [0, 384], sizes = [8, 128], strides = [1, 1]} : vector<8x512xf32> to vector<8x128xf32>
    %127 = arith.mulf %118, %126 : vector<8x128xf32>
    %128 = arith.addf %125, %127 : vector<8x128xf32>
    %129 = math.tanh %128 : vector<8x128xf32>
    %130 = arith.subf %70, %129 : vector<8x128xf32>
    %131 = arith.mulf %124, %130 : vector<8x128xf32>
    %132 = arith.addf %129, %131 : vector<8x128xf32>
    %133 = arith.addi %9, %c1_i32 : i32
    %134 = vector.broadcast %133 : i32 to vector<8x1xi32>
    %135 = arith.cmpi eq, %8, %134 : vector<8x1xi32>
    %136 = vector.shape_cast %135 : vector<8x1xi1> to vector<8x1xi1>
    %137 = vector.broadcast %136 : vector<8x1xi1> to vector<8x128xi1>
    %138 = arith.select %137, %132, %76 : vector<8x128xi1>, vector<8x128xf32>
    %c2_i32 = arith.constant 2 : i32
    %c8_i32_39 = arith.constant 8 : i32
    %139 = arith.muli %c2_i32, %c8_i32_39 : i32
    %140 = tpu.assume_multiple %139, 8 : i32
    %141 = arith.index_cast %140 : i32 to index
    %c0_40 = arith.constant 0 : index
    %142 = vector.load %arg8[%141, %c0_40] : memref<32x384xf32, #tpu.memory_space<vmem>>, vector<8x384xf32>
    %143 = arith.truncf %107 : vector<8x128xf32> to vector<8x128xbf16>
    %c0_41 = arith.constant 0 : index
    %c0_42 = arith.constant 0 : index
    %144 = vector.load %arg5[%c0_41, %c0_42] : memref<128x384xbf16, #tpu.memory_space<vmem>>, vector<128x384xbf16>
    %cst_43 = arith.constant dense<0.000000e+00> : vector<8x384xf32>
    %145 = tpu.matmul %143, %144, %cst_43 {dimension_numbers = #tpu.dot_dimension_numbers<[1], [0], [0], [1], [0, 0, 1, 1], [], []>} : vector<8x128xbf16>, vector<128x384xbf16>, vector<8x384xf32> -> vector<8x384xf32>
    %146 = vector.extract_strided_slice %142 {offsets = [0, 0], sizes = [8, 128], strides = [1, 1]} : vector<8x384xf32> to vector<8x128xf32>
    %147 = vector.extract_strided_slice %145 {offsets = [0, 0], sizes = [8, 128], strides = [1, 1]} : vector<8x384xf32> to vector<8x128xf32>
    %148 = arith.addf %146, %147 : vector<8x128xf32>
    %149 = arith.negf %148 : vector<8x128xf32>
    %150 = math.exp %149 : vector<8x128xf32>
    %cst_44 = arith.constant 1.000000e+00 : f32
    %151 = vector.broadcast %cst_44 : f32 to vector<8x128xf32>
    %152 = arith.addf %151, %150 : vector<8x128xf32>
    %153 = arith.divf %151, %152 : vector<8x128xf32>
    %154 = vector.extract_strided_slice %142 {offsets = [0, 128], sizes = [8, 128], strides = [1, 1]} : vector<8x384xf32> to vector<8x128xf32>
    %155 = vector.extract_strided_slice %145 {offsets = [0, 128], sizes = [8, 128], strides = [1, 1]} : vector<8x384xf32> to vector<8x128xf32>
    %156 = arith.addf %154, %155 : vector<8x128xf32>
    %157 = arith.negf %156 : vector<8x128xf32>
    %158 = math.exp %157 : vector<8x128xf32>
    %cst_45 = arith.constant 1.000000e+00 : f32
    %159 = vector.broadcast %cst_45 : f32 to vector<8x128xf32>
    %160 = arith.addf %159, %158 : vector<8x128xf32>
    %161 = arith.divf %159, %160 : vector<8x128xf32>
    %162 = vector.extract_strided_slice %142 {offsets = [0, 256], sizes = [8, 128], strides = [1, 1]} : vector<8x384xf32> to vector<8x128xf32>
    %163 = vector.extract_strided_slice %145 {offsets = [0, 256], sizes = [8, 128], strides = [1, 1]} : vector<8x384xf32> to vector<8x128xf32>
    %164 = arith.mulf %153, %163 : vector<8x128xf32>
    %165 = arith.addf %162, %164 : vector<8x128xf32>
    %166 = math.tanh %165 : vector<8x128xf32>
    %167 = arith.subf %107, %166 : vector<8x128xf32>
    %168 = arith.mulf %161, %167 : vector<8x128xf32>
    %169 = arith.addf %166, %168 : vector<8x128xf32>
    %170 = arith.truncf %169 : vector<8x128xf32> to vector<8x128xbf16>
    %171 = arith.truncf %132 : vector<8x128xf32> to vector<8x128xbf16>
    %172 = tpu.concatenate %170, %171 in 1 : vector<8x128xbf16>, vector<8x128xbf16> -> vector<8x256xbf16>
    %c0_46 = arith.constant 0 : index
    %c0_47 = arith.constant 0 : index
    %173 = vector.load %arg6[%c0_46, %c0_47] : memref<256x512xbf16, #tpu.memory_space<vmem>>, vector<256x512xbf16>
    %cst_48 = arith.constant dense<0.000000e+00> : vector<8x512xf32>
    %174 = tpu.matmul %172, %173, %cst_48 {dimension_numbers = #tpu.dot_dimension_numbers<[1], [0], [0], [1], [0, 0, 1, 1], [], []>} : vector<8x256xbf16>, vector<256x512xbf16>, vector<8x512xf32> -> vector<8x512xf32>
    %175 = vector.extract_strided_slice %174 {offsets = [0, 0], sizes = [8, 128], strides = [1, 1]} : vector<8x512xf32> to vector<8x128xf32>
    %176 = arith.negf %175 : vector<8x128xf32>
    %177 = math.exp %176 : vector<8x128xf32>
    %cst_49 = arith.constant 1.000000e+00 : f32
    %178 = vector.broadcast %cst_49 : f32 to vector<8x128xf32>
    %179 = arith.addf %178, %177 : vector<8x128xf32>
    %180 = arith.divf %178, %179 : vector<8x128xf32>
    %181 = vector.extract_strided_slice %174 {offsets = [0, 128], sizes = [8, 128], strides = [1, 1]} : vector<8x512xf32> to vector<8x128xf32>
    %182 = arith.negf %181 : vector<8x128xf32>
    %183 = math.exp %182 : vector<8x128xf32>
    %cst_50 = arith.constant 1.000000e+00 : f32
    %184 = vector.broadcast %cst_50 : f32 to vector<8x128xf32>
    %185 = arith.addf %184, %183 : vector<8x128xf32>
    %186 = arith.divf %184, %185 : vector<8x128xf32>
    %187 = vector.extract_strided_slice %174 {offsets = [0, 256], sizes = [8, 128], strides = [1, 1]} : vector<8x512xf32> to vector<8x128xf32>
    %188 = vector.extract_strided_slice %174 {offsets = [0, 384], sizes = [8, 128], strides = [1, 1]} : vector<8x512xf32> to vector<8x128xf32>
    %189 = arith.mulf %180, %188 : vector<8x128xf32>
    %190 = arith.addf %187, %189 : vector<8x128xf32>
    %191 = math.tanh %190 : vector<8x128xf32>
    %192 = arith.subf %132, %191 : vector<8x128xf32>
    %193 = arith.mulf %186, %192 : vector<8x128xf32>
    %194 = arith.addf %191, %193 : vector<8x128xf32>
    %195 = arith.addi %9, %c2_i32 : i32
    %196 = vector.broadcast %195 : i32 to vector<8x1xi32>
    %197 = arith.cmpi eq, %8, %196 : vector<8x1xi32>
    %198 = vector.shape_cast %197 : vector<8x1xi1> to vector<8x1xi1>
    %199 = vector.broadcast %198 : vector<8x1xi1> to vector<8x128xi1>
    %200 = arith.select %199, %194, %138 : vector<8x128xi1>, vector<8x128xf32>
    %c3_i32 = arith.constant 3 : i32
    %c8_i32_51 = arith.constant 8 : i32
    %201 = arith.muli %c3_i32, %c8_i32_51 : i32
    %202 = tpu.assume_multiple %201, 8 : i32
    %203 = arith.index_cast %202 : i32 to index
    %c0_52 = arith.constant 0 : index
    %204 = vector.load %arg8[%203, %c0_52] : memref<32x384xf32, #tpu.memory_space<vmem>>, vector<8x384xf32>
    %205 = arith.truncf %169 : vector<8x128xf32> to vector<8x128xbf16>
    %c0_53 = arith.constant 0 : index
    %c0_54 = arith.constant 0 : index
    %206 = vector.load %arg5[%c0_53, %c0_54] : memref<128x384xbf16, #tpu.memory_space<vmem>>, vector<128x384xbf16>
    %cst_55 = arith.constant dense<0.000000e+00> : vector<8x384xf32>
    %207 = tpu.matmul %205, %206, %cst_55 {dimension_numbers = #tpu.dot_dimension_numbers<[1], [0], [0], [1], [0, 0, 1, 1], [], []>} : vector<8x128xbf16>, vector<128x384xbf16>, vector<8x384xf32> -> vector<8x384xf32>
    %208 = vector.extract_strided_slice %204 {offsets = [0, 0], sizes = [8, 128], strides = [1, 1]} : vector<8x384xf32> to vector<8x128xf32>
    %209 = vector.extract_strided_slice %207 {offsets = [0, 0], sizes = [8, 128], strides = [1, 1]} : vector<8x384xf32> to vector<8x128xf32>
    %210 = arith.addf %208, %209 : vector<8x128xf32>
    %211 = arith.negf %210 : vector<8x128xf32>
    %212 = math.exp %211 : vector<8x128xf32>
    %cst_56 = arith.constant 1.000000e+00 : f32
    %213 = vector.broadcast %cst_56 : f32 to vector<8x128xf32>
    %214 = arith.addf %213, %212 : vector<8x128xf32>
    %215 = arith.divf %213, %214 : vector<8x128xf32>
    %216 = vector.extract_strided_slice %204 {offsets = [0, 128], sizes = [8, 128], strides = [1, 1]} : vector<8x384xf32> to vector<8x128xf32>
    %217 = vector.extract_strided_slice %207 {offsets = [0, 128], sizes = [8, 128], strides = [1, 1]} : vector<8x384xf32> to vector<8x128xf32>
    %218 = arith.addf %216, %217 : vector<8x128xf32>
    %219 = arith.negf %218 : vector<8x128xf32>
    %220 = math.exp %219 : vector<8x128xf32>
    %cst_57 = arith.constant 1.000000e+00 : f32
    %221 = vector.broadcast %cst_57 : f32 to vector<8x128xf32>
    %222 = arith.addf %221, %220 : vector<8x128xf32>
    %223 = arith.divf %221, %222 : vector<8x128xf32>
    %224 = vector.extract_strided_slice %204 {offsets = [0, 256], sizes = [8, 128], strides = [1, 1]} : vector<8x384xf32> to vector<8x128xf32>
    %225 = vector.extract_strided_slice %207 {offsets = [0, 256], sizes = [8, 128], strides = [1, 1]} : vector<8x384xf32> to vector<8x128xf32>
    %226 = arith.mulf %215, %225 : vector<8x128xf32>
    %227 = arith.addf %224, %226 : vector<8x128xf32>
    %228 = math.tanh %227 : vector<8x128xf32>
    %229 = arith.subf %169, %228 : vector<8x128xf32>
    %230 = arith.mulf %223, %229 : vector<8x128xf32>
    %231 = arith.addf %228, %230 : vector<8x128xf32>
    %232 = arith.truncf %231 : vector<8x128xf32> to vector<8x128xbf16>
    %233 = arith.truncf %194 : vector<8x128xf32> to vector<8x128xbf16>
    %234 = tpu.concatenate %232, %233 in 1 : vector<8x128xbf16>, vector<8x128xbf16> -> vector<8x256xbf16>
    %c0_58 = arith.constant 0 : index
    %c0_59 = arith.constant 0 : index
    %235 = vector.load %arg6[%c0_58, %c0_59] : memref<256x512xbf16, #tpu.memory_space<vmem>>, vector<256x512xbf16>
    %cst_60 = arith.constant dense<0.000000e+00> : vector<8x512xf32>
    %236 = tpu.matmul %234, %235, %cst_60 {dimension_numbers = #tpu.dot_dimension_numbers<[1], [0], [0], [1], [0, 0, 1, 1], [], []>} : vector<8x256xbf16>, vector<256x512xbf16>, vector<8x512xf32> -> vector<8x512xf32>
    %237 = vector.extract_strided_slice %236 {offsets = [0, 0], sizes = [8, 128], strides = [1, 1]} : vector<8x512xf32> to vector<8x128xf32>
    %238 = arith.negf %237 : vector<8x128xf32>
    %239 = math.exp %238 : vector<8x128xf32>
    %cst_61 = arith.constant 1.000000e+00 : f32
    %240 = vector.broadcast %cst_61 : f32 to vector<8x128xf32>
    %241 = arith.addf %240, %239 : vector<8x128xf32>
    %242 = arith.divf %240, %241 : vector<8x128xf32>
    %243 = vector.extract_strided_slice %236 {offsets = [0, 128], sizes = [8, 128], strides = [1, 1]} : vector<8x512xf32> to vector<8x128xf32>
    %244 = arith.negf %243 : vector<8x128xf32>
    %245 = math.exp %244 : vector<8x128xf32>
    %cst_62 = arith.constant 1.000000e+00 : f32
    %246 = vector.broadcast %cst_62 : f32 to vector<8x128xf32>
    %247 = arith.addf %246, %245 : vector<8x128xf32>
    %248 = arith.divf %246, %247 : vector<8x128xf32>
    %249 = vector.extract_strided_slice %236 {offsets = [0, 256], sizes = [8, 128], strides = [1, 1]} : vector<8x512xf32> to vector<8x128xf32>
    %250 = vector.extract_strided_slice %236 {offsets = [0, 384], sizes = [8, 128], strides = [1, 1]} : vector<8x512xf32> to vector<8x128xf32>
    %251 = arith.mulf %242, %250 : vector<8x128xf32>
    %252 = arith.addf %249, %251 : vector<8x128xf32>
    %253 = math.tanh %252 : vector<8x128xf32>
    %254 = arith.subf %194, %253 : vector<8x128xf32>
    %255 = arith.mulf %248, %254 : vector<8x128xf32>
    %256 = arith.addf %253, %255 : vector<8x128xf32>
    %257 = arith.addi %9, %c3_i32 : i32
    %258 = vector.broadcast %257 : i32 to vector<8x1xi32>
    %259 = arith.cmpi eq, %8, %258 : vector<8x1xi32>
    %260 = vector.shape_cast %259 : vector<8x1xi1> to vector<8x1xi1>
    %261 = vector.broadcast %260 : vector<8x1xi1> to vector<8x128xi1>
    %262 = arith.select %261, %256, %200 : vector<8x128xi1>, vector<8x128xf32>
    %c4_i32_63 = arith.constant 4 : i32
    %c0_64 = arith.constant 0 : index
    %c0_65 = arith.constant 0 : index
    %c0_66 = arith.constant 0 : index
    %263 = vector.load %arg9[%c0_64, %c0_65, %c0_66] : memref<2x8x128xf32, #tpu.memory_space<vmem>>, vector<1x8x128xf32>
    %264 = vector.shape_cast %263 : vector<1x8x128xf32> to vector<8x128xf32>
    %265 = vector.shape_cast %231 : vector<8x128xf32> to vector<1x8x128xf32>
    tpu.vector_store %arg9[%c0_64, %c0_65, %c0_66], %265 {strides = array<i32>} : memref<2x8x128xf32, #tpu.memory_space<vmem>>, vector<1x8x128xf32>,
    %c1_67 = arith.constant 1 : index
    %c0_68 = arith.constant 0 : index
    %c0_69 = arith.constant 0 : index
    %266 = vector.load %arg9[%c1_67, %c0_68, %c0_69] : memref<2x8x128xf32, #tpu.memory_space<vmem>>, vector<1x8x128xf32>
    %267 = vector.shape_cast %266 : vector<1x8x128xf32> to vector<8x128xf32>
    %268 = vector.shape_cast %256 : vector<8x128xf32> to vector<1x8x128xf32>
    tpu.vector_store %arg9[%c1_67, %c0_68, %c0_69], %268 {strides = array<i32>} : memref<2x8x128xf32, #tpu.memory_space<vmem>>, vector<1x8x128xf32>,
    %c0_70 = arith.constant 0 : index
    %c0_71 = arith.constant 0 : index
    %269 = vector.load %arg7[%c0_70, %c0_71] : memref<8x128xf32, #tpu.memory_space<vmem>>, vector<8x128xf32>
    tpu.vector_store %arg7[%c0_70, %c0_71], %262 {strides = array<i32>} : memref<8x128xf32, #tpu.memory_space<vmem>>, vector<8x128xf32>,
    return
  }
  func.func @transform_0(%arg0: i32, %arg1: i32) -> (i32, i32) {
    %c0_i32 = arith.constant 0 : i32
    %c0_i32_0 = arith.constant 0 : i32
    return %arg0, %c0_i32 : i32, i32
  }
  func.func @transform_1(%arg0: i32, %arg1: i32) -> (i32, i32) {
    %c2_i32 = arith.constant 2 : i32
    %0 = arith.muli %arg0, %c2_i32 : i32
    %1 = arith.addi %0, %arg1 : i32
    %c0_i32 = arith.constant 0 : i32
    %c0_i32_0 = arith.constant 0 : i32
    return %1, %c0_i32 : i32, i32
  }
  func.func @transform_2(%arg0: i32, %arg1: i32) -> (i32, i32) {
    %c0_i32 = arith.constant 0 : i32
    %c0_i32_0 = arith.constant 0 : i32
    %c0_i32_1 = arith.constant 0 : i32
    return %c0_i32, %c0_i32_0 : i32, i32
  }
  func.func @transform_3(%arg0: i32, %arg1: i32) -> (i32, i32) {
    %c0_i32 = arith.constant 0 : i32
    %c0_i32_0 = arith.constant 0 : i32
    %c0_i32_1 = arith.constant 0 : i32
    return %c0_i32, %c0_i32_0 : i32, i32
  }
  func.func @transform_4(%arg0: i32, %arg1: i32) -> (i32, i32) {
    %c0_i32 = arith.constant 0 : i32
    %c0_i32_0 = arith.constant 0 : i32
    %c0_i32_1 = arith.constant 0 : i32
    return %c0_i32, %c0_i32_0 : i32, i32
  }
  func.func @transform_5(%arg0: i32, %arg1: i32) -> (i32, i32) {
    %c0_i32 = arith.constant 0 : i32
    %c0_i32_0 = arith.constant 0 : i32
    return %arg0, %c0_i32 : i32, i32
  }
}

</mosaic_0001>

<bundles_post_ra>
// kernel: seq_encoder_gru_forward.1
= control target key start
LH: loop header
LB: loop body
LE: loop exit
PB: predicated region body
PF: predicated region fallthrough
CT: control target
= control target key end

     0   :  { %s2700_s18 = smov 0   ;;  %s2702_s19 = smov 0   ;;  %s3976_s0 = inlined_call_operand.vmem [shape: s32[16,1], index: 0, kind: input, shape index: {}]   ;;  %s3977_s1 = inlined_call_operand.vmem [shape: f32[128,16], index: 1, kind: input, shape index: {}]   ;;  %s3978_s2 = inlined_call_operand.vmem [shape: bf16[16,384], index: 2, kind: input, shape index: {}]   ;;  %s3979_s3 = inlined_call_operand.vmem [shape: bf16[128,384], index: 3, kind: input, shape index: {}]   ;;  %s3980_s4 = inlined_call_operand.vmem [shape: bf16[256,512], index: 4, kind: input, shape index: {}]   ;;  %s3981_s5 = inlined_call_operand.vmem [shape: f32[16,128], index: 5, kind: output, shape index: {}]  }
   0x1   :  { %s2704_s20 = smov 0   ;;  %s2706_s21 = smov 0  }
   0x2   :  { %s2708_s22 = smov 0  }
   0x3 LB: > { %s24_s23 = sadd.s32 1, %s2658_s20  ;;  %s27_s24 = sadd.s32 1, %s2662_s21  ;;  %s2666_s22 = sphi %s2708_s22, %s15_s22   ;;  %s2662_s21 = sphi %s2706_s21, %s4351_s21   ;;  %s2658_s20 = sphi %s2704_s20, %s4350_s20   ;;  %s2654_s19 = sphi %s2702_s19, %s4349_s19   ;;  %s2650_s18 = sphi %s2700_s18, %s4348_s18  }
   0x4   : > { %p25_p0 = scmp.ge.s32.totalorder %s24_s23, 2  ;;  %p2016_p1 = scmp.ge.s32.totalorder %s2666_s22, 1 }
   0x5   : > { %p217_p2 = scmp.lt.s32.totalorder %s2666_s22, 5 }
   0x6   : > { %s4353_s23 = smov (%p25_p0, %s24_s23), 0  ;;  %s4355_s24 = smov (!%p25_p0, %s27_s24), %s2662_s21 }
   0x7   : > { %p218_p3 = pnand %p2016_p1, %p217_p2  ;;  %p29_p4 = scmp.ge.s32.totalorder %s4355_s24, 2 }
   0x9   : > { %s4357_s24 = smov (%p29_p4, %s4355_s24), 0  ;;  %221 = sbr.rel (%p218_p3) target bundleno = 1054 (0x41e), region = 40 }
   0xe   : > { %p250_p5 = scmp.lt.s32.totalorder %s2654_s19, 1  ;;  %s2018_s25 = sshll.u32 %s2654_s19, 1 }
   0xf   : > { %s255_s26 = sadd.s32 %s2650_s18, %s2018_s25  ;;  %p2022_p7 = scmp.ne.s32.totalorder %s2650_s18, 0 }
  0x10   : > { %s4359_s19 = smov (!%p250_p5, %s2654_s19), 1  ;;  %s2019_s27 = sshll.u32 %s255_s26, 2 }
  0x11   : > { %s2017_s28 = sshll.u32 %s4359_s19, 3  ;;  %p257_p6 = scmp.lt.s32.totalorder %s2019_s27, 15 }
  0x12   : > { %s2736_s6 = scalar_lea.vmem %s3976_s0, %s2017_s28  ;;  %s2741_s9 = scalar_lea.vmem %s3981_s5, %s2017_s28 }
  0x13   : > { %s4361_s27 = smov (!%p257_p6, %s2019_s27), 15  ;;  %272 = sbr.rel (%p2022_p7) target bundleno = 28 (0x1c), region = 44 }
  0x14   : > { %s2020_s10 = sshll.u32 %s4361_s27, 3 }
  0x15   : > { %s2746_s13 = scalar_lea.vmem %s3977_s1, %s2020_s10 }
  0x18   : > { %v2668_v0 = vmov 0.0  }
  0x19   : > { %273 = vst [vmem:[#allocation3] sm:$0xff] %v2668_v0 }
  0x1a   : > { %274 = vst [vmem:[#allocation3 + $0x8] sm:$0xff] %v2668_v0 }
  0x1b   : > { %275 = vst [vmem:[%s2741_s9] sm:$0xff] %v2668_v0 }
  0x1c PF: > { %v2025_v1 = vld [vmem:[%s3978_s2] sm:$0xf]  ;;  %v2413_v2 = vld [vmem:[%s3978_s2 + $0x8] sm:$0xf0]  ;;  %v2128_v3 = vld [vmem:[%s3979_s3 + $0xa8] sm:$0xf] }
  0x1d   : > { %v2026_v4 = vor.u32 %v2413_v2, %v2025_v1  ;;  %v2437_v5 = vld [vmem:[%s3979_s3 + $0xb0] sm:$0xf0]  ;;  %v276_v6 = vld [vmem:[%s2746_s13] sm:$0xff]  ;;  %v277_v7 = vld [vmem:[%s2746_s13 + $0x8] sm:$0xff]  ;;  %vm302_vm0 = vcmask 130048  }
  0x1e   : > { %v2764_v8 = vor.u32 %v2437_v5, %v2128_v3  ;;  %v2766_v9 = vpack.c.bf16 %v277_v7, %v276_v6  ;;  %v2116_v10 = vld [vmem:[%s3979_s3 + $0x90] sm:$0xf]  ;;  %v2434_v11 = vld [vmem:[%s3979_s3 + $0x98] sm:$0xf0]  ;;  %v2436_v12 = vld [vmem:[%s3979_s3 + $0xac] sm:$0xf] }
  0x1f   : > { %316 = vmatpush.bf16.msra.mxu0 %v2026_v4  ;;  %v2130_v13 = vld [vmem:[%s3979_s3 + $0xb4] sm:$0xf0]  ;;  %v2781_v14 = vor.u32 %v2434_v11, %v2116_v10  ;;  %v2433_v16 = vld [vmem:[%s3979_s3 + $0x94] sm:$0xf]  ;;  %v2118_v17 = vld [vmem:[%s3979_s3 + $0x9c] sm:$0xf0] }
  0x20   : > { %551 = vmatpush.bf16.msra.mxu3 %v2764_v8  ;;  %v2783_v15 = vor.u32 %v2436_v12, %v2130_v13  ;;  %v2104_v18 = vld [vmem:[%s3979_s3 + $0x78] sm:$0xf]  ;;  %v2431_v19 = vld [vmem:[%s3979_s3 + $0x80] sm:$0xf0]  ;;  %v2800_v20 = vor.u32 %v2433_v16, %v2118_v17  ;;  %v2092_v22 = vld [vmem:[%s3979_s3 + $0x60] sm:$0xf] }
  0x21   : > { %v2803_v21 = vor.u32 %v2431_v19, %v2104_v18  ;;  %v2430_v23 = vld [vmem:[%s3979_s3 + $0x7c] sm:$0xf]  ;;  %v2106_v24 = vld [vmem:[%s3979_s3 + $0x84] sm:$0xf0]  ;;  %v2428_v25 = vld [vmem:[%s3979_s3 + $0x68] sm:$0xf0] }
  0x22   : > { %4114 = vst [vmem:[#allocation4_spill] sm:$0xff] %v2783_v15  ;;  %2035 = vmatmul.msk.bf16.vlgmr.msra.gmra.mxu0 %vm302_vm0, %v2766_v9  ;;  %v2412_v26 = vld [vmem:[%s3978_s2 + $0x4] sm:$0xf]  ;;  %v2027_v27 = vld [vmem:[%s3978_s2 + $0xc] sm:$0xf0]  ;;  %v2824_v29 = vor.u32 %v2430_v23, %v2106_v24  ;;  %v2827_v30 = vor.u32 %v2428_v25, %v2092_v22  ;;  %v279_v42 = vld [vmem:[%s2746_s13 + $0x18] sm:$0xff] }
  0x23   : > { %564 = vmatpush.bf16.msrb.mxu0 %v2783_v15  ;;  %4115 = vst [vmem:[#allocation5_spill] sm:$0xff] %v2800_v20  ;;  %v2030_v28 = vor.u32 %v2412_v26, %v2027_v27  ;;  %v2427_v31 = vld [vmem:[%s3979_s3 + $0x64] sm:$0xf]  ;;  %v2094_v32 = vld [vmem:[%s3979_s3 + $0x6c] sm:$0xf0] }
  0x24   : > { %552 = vmatpush.bf16.msra.mxu3 %v2781_v14  ;;  %4116 = vst [vmem:[#allocation6_spill] sm:$0xff] %v2824_v29  ;;  %v2136_v33 = vld [vmem:[%s3979_s3 + $0xb0] sm:$0xf]  ;;  %v2080_v34 = vld [vmem:[%s3979_s3 + $0x48] sm:$0xf]  ;;  %v2856_v40 = vor.u32 %v2427_v31, %v2094_v32  ;;  %v2964_v17 = vld [vmem:[#allocation3] sm:$0xff] }
  0x25   : > { %4117 = vst [vmem:[#allocation7_spill] sm:$0xff] %v2827_v30  ;;  %335 = vmatpush.bf16.msra.mxu1 %v2030_v28  ;;  %v2425_v35 = vld [vmem:[%s3979_s3 + $0x50] sm:$0xf0]  ;;  %v2438_v36 = vld [vmem:[%s3979_s3 + $0xb8] sm:$0xf0]  ;;  %v390_v27 = vpack.c.bf16 %v2964_v17, %v2964_v17 }
  0x26   : > { %v2847_v37 = vor.u32 %v2438_v36, %v2136_v33  ;;  %v2124_v38 = vld [vmem:[%s3979_s3 + $0x98] sm:$0xf]  ;;  %v2435_v39 = vld [vmem:[%s3979_s3 + $0xa0] sm:$0xf0]  ;;  %4118 = vst [vmem:[#allocation8_spill] sm:$0xff] %v2856_v40  ;;  %v278_v41 = vld [vmem:[%s2746_s13 + $0x10] sm:$0xff]  ;;  %v2866_v44 = vor.u32 %v2425_v35, %v2080_v34 }
  0x27   : > { %565 = vmatpush.bf16.msrb.mxu0 %v2800_v20  ;;  %v2068_v43 = vld [vmem:[%s3979_s3 + $0x30] sm:$0xf]  ;;  %v2422_v45 = vld [vmem:[%s3979_s3 + $0x38] sm:$0xf0]  ;;  %v2424_v46 = vld [vmem:[%s3979_s3 + $0x4c] sm:$0xf]  ;;  %v2878_v48 = vor.u32 %v2435_v39, %v2124_v38  ;;  %v2889_v52 = vpack.c.bf16 %v279_v42, %v278_v41 }
  0x28   : > { %553 = vmatpush.bf16.msra.mxu3 %v2803_v21  ;;  %2037 = vmatmul.msk.bf16.vlgmr.msra.gmra.mxu1 %vm302_vm0, %v2766_v9  ;;  %4119 = vst [vmem:[#allocation9_spill] sm:$0xff] %v2866_v44  ;;  %v2082_v47 = vld [vmem:[%s3979_s3 + $0x54] sm:$0xf0]  ;;  %v2112_v49 = vld [vmem:[%s3979_s3 + $0x80] sm:$0xf]  ;;  %v2898_v56 = vor.u32 %v2422_v45, %v2068_v43  ;;  %s3648_s13 = sshll.u32 %s2650_s18, 2 }
  0x29   : > { %577 = vmatpush.bf16.msrb.mxu1 %v2847_v37  ;;  %v2432_v50 = vld [vmem:[%s3979_s3 + $0x88] sm:$0xf0]  ;;  %v2033_v51 = vld [vmem:[%s3978_s2 + $0x8] sm:$0xf]  ;;  %v2414_v53 = vld [vmem:[%s3978_s2 + $0x10] sm:$0xf0]  ;;  %v2895_v54 = vor.u32 %v2424_v46, %v2082_v47 }
  0x2a   : > { %v2034_v55 = vor.u32 %v2414_v53, %v2033_v51  ;;  %4121 = vst [vmem:[#allocation11_spill] sm:$0xff] %v2898_v56  ;;  %v2056_v57 = vld [vmem:[%s3979_s3 + $0x18] sm:$0xf]  ;;  %v2421_v58 = vld [vmem:[%s3979_s3 + $0x34] sm:$0xf]  ;;  %v2910_v60 = vor.u32 %v2432_v50, %v2112_v49  ;;  %s1419_s18 = sadd.s32 1, %s3648_s13 }
  0x2b   : > { %566 = vmatpush.bf16.msrb.mxu0 %v2824_v29  ;;  %4120 = vst [vmem:[#allocation10_spill] sm:$0xff] %v2895_v54  ;;  %v2070_v59 = vld [vmem:[%s3979_s3 + $0x3c] sm:$0xf0]  ;;  %v2419_v61 = vld [vmem:[%s3979_s3 + $0x20] sm:$0xf0]  ;;  %s1669_s30 = sadd.s32 2, %s3648_s13 }
  0x2c   : > { %554 = vmatpush.bf16.msra.mxu3 %v2827_v30  ;;  %v2100_v62 = vld [vmem:[%s3979_s3 + $0x68] sm:$0xf]  ;;  %v2429_v63 = vld [vmem:[%s3979_s3 + $0x70] sm:$0xf0]  ;;  %354 = vmatpush.bf16.msra.mxu2 %v2034_v55  ;;  %v2924_v0 = vor.u32 %v2421_v58, %v2070_v59  ;;  %v2927_v1 = vor.u32 %v2419_v61, %v2056_v57  ;;  %v2044_v2 = vld [vmem:[%s3979_s3] sm:$0xf] }
  0x2d   : > { %578 = vmatpush.bf16.msrb.mxu1 %v2878_v48  ;;  %v2418_v3 = vld [vmem:[%s3979_s3 + $0x1c] sm:$0xf]  ;;  %v2058_v4 = vld [vmem:[%s3979_s3 + $0x24] sm:$0xf0]  ;;  %v2939_v5 = vor.u32 %v2429_v63, %v2100_v62  ;;  %v2416_v6 = vld [vmem:[%s3979_s3 + $0x8] sm:$0xf0] }
  0x2e   : > { %4122 = vst [vmem:[#allocation12_spill] sm:$0xff] %v2924_v0  ;;  %v2088_v7 = vld [vmem:[%s3979_s3 + $0x50] sm:$0xf]  ;;  %v2426_v10 = vld [vmem:[%s3979_s3 + $0x58] sm:$0xf0]  ;;  %v2959_v13 = vor.u32 %v2418_v3, %v2058_v4  ;;  %v2962_v16 = vor.u32 %v2416_v6, %v2044_v2  ;;  %s1919_s7 = sadd.s32 3, %s3648_s13 }
  0x2f   : > { %567 = vmatpush.bf16.msrb.mxu0 %v2856_v40  ;;  %4123 = vst [vmem:[#allocation13_spill] sm:$0xff] %v2927_v1  ;;  %2039 = vmatmul.msk.bf16.vlgmr.msra.gmra.mxu2 %vm302_vm0, %v2766_v9  ;;  %v2382_v11 = vld [vmem:[%s3980_s4 + $0x1e0] sm:$0xf]  ;;  %v2501_v12 = vld [vmem:[%s3980_s4 + $0x1ec] sm:$0xf0]  ;;  %v2973_v19 = vor.u32 %v2426_v10, %v2088_v7 }
  0x30   : > { %555 = vmatpush.bf16.msra.mxu3 %v2866_v44  ;;  %4124 = vst [vmem:[#allocation14_spill] sm:$0xff] %v2939_v5  ;;  %v2415_v9 = vld [vmem:[%s3979_s3 + $0x4] sm:$0xf]  ;;  %v2046_v18 = vld [vmem:[%s3979_s3 + $0xc] sm:$0xf0]  ;;  %v2981_v24 = vor.u32 %v2501_v12, %v2382_v11 }
  0x31   : > { %579 = vmatpush.bf16.msrb.mxu1 %v2910_v60  ;;  %4125 = vst [vmem:[#allocation15_spill] sm:$0xff] %v2959_v13  ;;  %v2076_v22 = vld [vmem:[%s3979_s3 + $0x38] sm:$0xf]  ;;  %v2423_v23 = vld [vmem:[%s3979_s3 + $0x40] sm:$0xf0]  ;;  %v2992_v28 = vor.u32 %v2415_v9, %v2046_v18 }
  0x32   : > { %2036 = vmatmul.msk.bf16.gmra.mxu0 %vm302_vm0, %v2889_v52  ;;  %4126 = vst [vmem:[#allocation16_spill] sm:$0xff] %v2962_v16  ;;  %v2366_v25 = vld [vmem:[%s3980_s4 + $0x1c0] sm:$0xf]  ;;  %v2497_v26 = vld [vmem:[%s3980_s4 + $0x1cc] sm:$0xf0]  ;;  %v2998_v31 = vor.u32 %v2423_v23, %v2076_v22 }
  0x33   : > { %568 = vmatpush.bf16.msrb.mxu0 %v2895_v54  ;;  %4127 = vst [vmem:[#allocation17_spill] sm:$0xff] %v2973_v19  ;;  %v2064_v32 = vld [vmem:[%s3979_s3 + $0x20] sm:$0xf]  ;;  %v2420_v33 = vld [vmem:[%s3979_s3 + $0x28] sm:$0xf0]  ;;  %v3007_v34 = vor.u32 %v2497_v26, %v2366_v25 }
  0x34   : > { %556 = vmatpush.bf16.msra.mxu3 %v2898_v56  ;;  %4128 = vst [vmem:[#allocation18_spill] sm:$0xff] %v2981_v24  ;;  %v3011_v35 = vor.u32 %v2420_v33, %v2064_v32  ;;  %v2052_v36 = vld [vmem:[%s3979_s3 + $0x8] sm:$0xf]  ;;  %v2417_v38 = vld [vmem:[%s3979_s3 + $0x10] sm:$0xf0] }
  0x35   : > { %580 = vmatpush.bf16.msrb.mxu1 %v2939_v5  ;;  %4129 = vst [vmem:[#allocation19_spill] sm:$0xff] %v2992_v28  ;;  %v3021_v39 = vor.u32 %v2417_v38, %v2052_v36  ;;  %v2350_v41 = vld [vmem:[%s3980_s4 + $0x1a0] sm:$0xf]  ;;  %v2493_v42 = vld [vmem:[%s3980_s4 + $0x1ac] sm:$0xf0] }
  0x36   : > { %4130 = vst [vmem:[#allocation20_spill] sm:$0xff] %v2998_v31  ;;  %v2334_v43 = vld [vmem:[%s3980_s4 + $0x180] sm:$0xf]  ;;  %v3035_v45 = vor.u32 %v2493_v42, %v2350_v41  ;;  %v2489_v46 = vld [vmem:[%s3980_s4 + $0x18c] sm:$0xf0] }
  0x37   : > { %569 = vmatpush.bf16.msrb.mxu0 %v2924_v0  ;;  %4131 = vst [vmem:[#allocation21_spill] sm:$0xff] %v3007_v34  ;;  %v3041_v47 = vor.u32 %v2489_v46, %v2334_v43  ;;  %v2318_v49 = vld [vmem:[%s3980_s4 + $0x160] sm:$0xf]  ;;  %v2485_v50 = vld [vmem:[%s3980_s4 + $0x16c] sm:$0xf0] }
  0x38   : > { %557 = vmatpush.bf16.msra.mxu3 %v2927_v1  ;;  %2038 = vmatmul.msk.bf16.gmra.mxu1 %vm302_vm0, %v2889_v52  ;;  %4132 = vst [vmem:[#allocation22_spill] sm:$0xff] %v3011_v35  ;;  %v2302_v51 = vld [vmem:[%s3980_s4 + $0x140] sm:$0xf]  ;;  %v2481_v53 = vld [vmem:[%s3980_s4 + $0x14c] sm:$0xf0] }
  0x39   : > { %581 = vmatpush.bf16.msrb.mxu1 %v2973_v19  ;;  %4133 = vst [vmem:[#allocation23_spill] sm:$0xff] %v3021_v39  ;;  %v3059_v55 = vor.u32 %v2481_v53, %v2302_v51  ;;  %v2286_v57 = vld [vmem:[%s3980_s4 + $0x120] sm:$0xf]  ;;  %v2477_v58 = vld [vmem:[%s3980_s4 + $0x12c] sm:$0xf0] }
  0x3a   : > { %4134 = vst [vmem:[#allocation24_spill] sm:$0xff] %v3035_v45  ;;  %v2270_v59 = vld [vmem:[%s3980_s4 + $0x100] sm:$0xf]  ;;  %v3071_v61 = vor.u32 %v2477_v58, %v2286_v57  ;;  %v2473_v62 = vld [vmem:[%s3980_s4 + $0x10c] sm:$0xf0] }
  0x3b   : > { %570 = vmatpush.bf16.msrb.mxu0 %v2959_v13  ;;  %4135 = vst [vmem:[#allocation25_spill] sm:$0xff] %v3041_v47  ;;  %v3077_v63 = vor.u32 %v2473_v62, %v2270_v59  ;;  %v2390_v2 = vld [vmem:[%s3980_s4 + $0x1e8] sm:$0xf]  ;;  %v2502_v3 = vld [vmem:[%s3980_s4 + $0x1f4] sm:$0xf0] }
  0x3c   : > { %558 = vmatpush.bf16.msra.mxu3 %v2962_v16  ;;  %4137 = vst [vmem:[#allocation27_spill] sm:$0xff] %v3059_v55  ;;  %v3086_v4 = vor.u32 %v2502_v3, %v2390_v2  ;;  %v2254_v6 = vld [vmem:[%s3980_s4 + $0xe0] sm:$0xf]  ;;  %v2469_v7 = vld [vmem:[%s3980_s4 + $0xec] sm:$0xf0] }
  0x3d   : > { %582 = vmatpush.bf16.msrb.mxu1 %v2998_v31  ;;  %4138 = vst [vmem:[#allocation28_spill] sm:$0xff] %v3071_v61  ;;  %v2467_v10 = vld [vmem:[%s3980_s4 + $0xe4] sm:$0xf]  ;;  %v3098_v11 = vor.u32 %v2469_v7, %v2254_v6  ;;  %v2256_v12 = vld [vmem:[%s3980_s4 + $0xf0] sm:$0xf0] }
  0x3e   : > { %4139 = vst [vmem:[#allocation29_spill] sm:$0xff] %v3077_v63  ;;  %v2374_v9 = vld [vmem:[%s3980_s4 + $0x1c8] sm:$0xf]  ;;  %v2498_v18 = vld [vmem:[%s3980_s4 + $0x1d4] sm:$0xf0]  ;;  %v3109_v22 = vor.u32 %v2467_v10, %v2256_v12 }
  0x3f   : > { %559 = vmatmul.bf16.vlgmr.msra.gmra.mxu3 %v390_v27  ;;  %571 = vmatpush.bf16.msrb.mxu0 %v2992_v28  ;;  %4140 = vst [vmem:[#allocation30_spill] sm:$0xff] %v3086_v4  ;;  %v3111_v23 = vor.u32 %v2498_v18, %v2374_v9  ;;  %v2238_v25 = vld [vmem:[%s3980_s4 + $0xc0] sm:$0xf]  ;;  %v2465_v26 = vld [vmem:[%s3980_s4 + $0xcc] sm:$0xf0] }
  0x40   : > { %1035 = vmatpush.bf16.msrb.mxu3 %v2981_v24  ;;  %2040 = vmatmul.msk.bf16.gmra.mxu2 %vm302_vm0, %v2889_v52  ;;  %v3053_v52 = vor.u32 %v2485_v50, %v2318_v49  ;;  %4141 = vst [vmem:[#allocation31_spill] sm:$0xff] %v3109_v22  ;;  %v3123_v32 = vor.u32 %v2465_v26, %v2238_v25  ;;  %v2240_v33 = vld [vmem:[%s3980_s4 + $0xd0] sm:$0xf0]  ;;  %v2358_v38 = vld [vmem:[%s3980_s4 + $0x1a8] sm:$0xf] }
  0x41   : > { %583 = vmatpush.bf16.msrb.mxu1 %v3011_v35  ;;  %4142 = vst [vmem:[#allocation32_spill] sm:$0xff] %v3111_v23  ;;  %1022 = vmatpush.bf16.msrb.mxu2 %v3098_v11  ;;  %v2494_v41 = vld [vmem:[%s3980_s4 + $0x1b4] sm:$0xf0]  ;;  %v2222_v46 = vld [vmem:[%s3980_s4 + $0xa0] sm:$0xf] }
  0x42   : > { %572 = vmatmul.bf16.vlgmr.msrb.gmra.mxu0 %v390_v27  ;;  %4136 = vst [vmem:[#allocation26_spill] sm:$0xff] %v3053_v52  ;;  %v3139_v42 = vor.u32 %v2494_v41, %v2358_v38  ;;  %v2461_v49 = vld [vmem:[%s3980_s4 + $0xac] sm:$0xf0]  ;;  %v2459_v50 = vld [vmem:[%s3980_s4 + $0xa4] sm:$0xf] }
  0x43   : > { %1048 = vmatpush.bf16.msra.mxu0 %v3109_v22  ;;  %v3154_v51 = vor.u32 %v2461_v49, %v2222_v46  ;;  %v2224_v53 = vld [vmem:[%s3980_s4 + $0xb0] sm:$0xf0]  ;;  %v2342_v57 = vld [vmem:[%s3980_s4 + $0x188] sm:$0xf]  ;;  %v2490_v58 = vld [vmem:[%s3980_s4 + $0x194] sm:$0xf0] }
  0x44   : > { %1036 = vmatpush.bf16.msrb.mxu3 %v3007_v34  ;;  %4144 = vst [vmem:[#allocation34_spill] sm:$0xff] %v3139_v42  ;;  %v3165_v59 = vor.u32 %v2459_v50, %v2224_v53  ;;  %v3167_v62 = vor.u32 %v2490_v58, %v2342_v57  ;;  %v2206_v2 = vld [vmem:[%s3980_s4 + $0x80] sm:$0xf]  ;;  %v2457_v3 = vld [vmem:[%s3980_s4 + $0x8c] sm:$0xf0] }
  0x45   : > { %584 = vmatpush.bf16.msrb.mxu1 %v3021_v39  ;;  %1023 = vmatpush.bf16.msrb.mxu2 %v3123_v32  ;;  %v2455_v6 = vld [vmem:[%s3980_s4 + $0x84] sm:$0xf]  ;;  %v3181_v7 = vor.u32 %v2457_v3, %v2206_v2  ;;  %v2208_v10 = vld [vmem:[%s3980_s4 + $0x90] sm:$0xf0]  ;;  %v2326_v26 = vld [vmem:[%s3980_s4 + $0x168] sm:$0xf] }
  0x46   : > { %4145 = vst [vmem:[#allocation35_spill] sm:$0xff] %v3167_v62  ;;  %v2499_v12 = vld [vmem:[%s3980_s4 + $0x1e4] sm:$0xf]  ;;  %v2384_v9 = vld [vmem:[%s3980_s4 + $0x1f0] sm:$0xf0]  ;;  %v3192_v18 = vor.u32 %v2455_v6, %v2208_v10 }
  0x47   : > { %v3194_v25 = vor.u32 %v2499_v12, %v2384_v9  ;;  %v2190_v46 = vld [vmem:[%s3980_s4 + $0x60] sm:$0xf]  ;;  %v2453_v49 = vld [vmem:[%s3980_s4 + $0x6c] sm:$0xf0]  ;;  %v2451_v50 = vld [vmem:[%s3980_s4 + $0x64] sm:$0xf] }
  0x48   : > { %585 = vmatmul.bf16.vlgmr.msrb.gmra.mxu1 %v390_v27  ;;  %1037 = vmatpush.bf16.msrb.mxu3 %v3035_v45  ;;  %v2463_v27 = vld [vmem:[%s3980_s4 + $0xc4] sm:$0xf]  ;;  %v3221_v53 = vor.u32 %v2453_v49, %v2190_v46  ;;  %v2192_v57 = vld [vmem:[%s3980_s4 + $0x70] sm:$0xf0]  ;;  %v2310_v10 = vld [vmem:[%s3980_s4 + $0x148] sm:$0xf] }
  0x49   : > { %v3129_v36 = vor.u32 %v2463_v27, %v2240_v33  ;;  %1024 = vmatpush.bf16.msrb.mxu2 %v3154_v51  ;;  %4146 = vst [vmem:[#allocation36_spill] sm:$0xff] %v3194_v25  ;;  %v2486_v27 = vld [vmem:[%s3980_s4 + $0x174] sm:$0xf0]  ;;  %1061 = vmatpush.bf16.msra.mxu1 %v3194_v25  ;;  %v2495_v58 = vld [vmem:[%s3980_s4 + $0x1c4] sm:$0xf]  ;;  %v3232_v3 = vor.u32 %v2451_v50, %v2192_v57 }
  0x4a   : > { %v3205_v38 = vor.u32 %v2486_v27, %v2326_v26  ;;  %v2368_v2 = vld [vmem:[%s3980_s4 + $0x1d0] sm:$0xf0]  ;;  %v2482_v12 = vld [vmem:[%s3980_s4 + $0x154] sm:$0xf0]  ;;  %v2174_v26 = vld [vmem:[%s3980_s4 + $0x40] sm:$0xf] }
  0x4b   : > { %4143 = vst [vmem:[#allocation33_spill] sm:$0xff] %v3129_v36  ;;  %1049 = vmatpush.bf16.msra.mxu0 %v3129_v36  ;;  %v3234_v6 = vor.u32 %v2495_v58, %v2368_v2  ;;  %v3243_v9 = vor.u32 %v2482_v12, %v2310_v10  ;;  %v2449_v27 = vld [vmem:[%s3980_s4 + $0x4c] sm:$0xf0]  ;;  %v2447_v46 = vld [vmem:[%s3980_s4 + $0x44] sm:$0xf] }
  0x4c   : > { %1038 = vmatpush.bf16.msrb.mxu3 %v3041_v47  ;;  %4148 = vst [vmem:[#allocation38_spill] sm:$0xff] %v3205_v38  ;;  %v3257_v49 = vor.u32 %v2449_v27, %v2174_v26  ;;  %v2176_v50 = vld [vmem:[%s3980_s4 + $0x50] sm:$0xf0]  ;;  %v2491_v57 = vld [vmem:[%s3980_s4 + $0x1a4] sm:$0xf] }
  0x4d   : > { %1025 = vmatpush.bf16.msrb.mxu2 %v3181_v7  ;;  %4149 = vst [vmem:[#allocation39_spill] sm:$0xff] %v3232_v3  ;;  %1062 = vmatpush.bf16.msra.mxu1 %v3234_v6  ;;  %v2352_v58 = vld [vmem:[%s3980_s4 + $0x1b0] sm:$0xf0]  ;;  %v3268_v2 = vor.u32 %v2447_v46, %v2176_v50  ;;  %v2294_v12 = vld [vmem:[%s3980_s4 + $0x128] sm:$0xf] }
  0x4e   : > { %4150 = vst [vmem:[#allocation40_spill] sm:$0xff] %v3234_v6  ;;  %v3270_v10 = vor.u32 %v2491_v57, %v2352_v58  ;;  %v2478_v26 = vld [vmem:[%s3980_s4 + $0x134] sm:$0xf0]  ;;  %v2158_v46 = vld [vmem:[%s3980_s4 + $0x20] sm:$0xf] }
  0x4f   : > { %1050 = vmatpush.bf16.msra.mxu0 %v3165_v59  ;;  %4151 = vst [vmem:[#allocation41_spill] sm:$0xff] %v3243_v9  ;;  %v2445_v50 = vld [vmem:[%s3980_s4 + $0x2c] sm:$0xf0]  ;;  %v2443_v57 = vld [vmem:[%s3980_s4 + $0x24] sm:$0xf] }
  0x50   : > { %1039 = vmatpush.bf16.msrb.mxu3 %v3053_v52  ;;  %4152 = vst [vmem:[#allocation42_spill] sm:$0xff] %v3268_v2  ;;  %v3297_v58 = vor.u32 %v2445_v50, %v2158_v46  ;;  %v2336_v46 = vld [vmem:[%s3980_s4 + $0x190] sm:$0xf0]  ;;  %v2278_v50 = vld [vmem:[%s3980_s4 + $0x108] sm:$0xf] }
  0x51   : > { %1026 = vmatpush.bf16.msrb.mxu2 %v3221_v53  ;;  %4153 = vst [vmem:[#allocation43_spill] sm:$0xff] %v3270_v10  ;;  %1063 = vmatpush.bf16.msra.mxu1 %v3270_v10  ;;  %v2360_v47 = vld [vmem:[%s3980_s4 + $0x1b8] sm:$0xf0] }
  0x52   : > { %v2296_v6 = vld [vmem:[%s3980_s4 + $0x138] sm:$0xf0] }
  0x53   : > { %1051 = vmatpush.bf16.msra.mxu0 %v3192_v18 }
  0x54   : > { %1040 = vmatpush.bf16.msrb.mxu3 %v3059_v55 }
  0x55   : > { %1027 = vmatpush.bf16.msrb.mxu2 %v3257_v49 }
  0x57   : > { %1052 = vmatpush.bf16.msra.mxu0 %v3232_v3 }
  0x58   : > { %1041 = vmatpush.bf16.msrb.mxu3 %v3071_v61 }
  0x59   : > { %1028 = vmatpush.bf16.msrb.mxu2 %v3297_v58 }
  0x5b   : > { %1053 = vmatpush.bf16.msra.mxu0 %v3268_v2 }
  0x5c   : > { %1042 = vmatpush.bf16.msrb.mxu3 %v3077_v63 }
  0x60   : > { %1087 = vmatpush.bf16.msra.mxu3 %v3086_v4 }
  0x64   : > { %1088 = vmatpush.bf16.msra.mxu3 %v3111_v23 }
  0x68   : > { %1089 = vmatpush.bf16.msra.mxu3 %v3139_v42  ;;  %v2439_v42 = vld [vmem:[%s3980_s4 + $0x4] sm:$0xf] }
  0x6c   : > { %1090 = vmatpush.bf16.msra.mxu3 %v3167_v62  ;;  %v2441_v62 = vld [vmem:[%s3980_s4 + $0xc] sm:$0xf0] }
  0x70   : > { %1091 = vmatpush.bf16.msra.mxu3 %v3205_v38 }
  0x74   : > { %1092 = vmatpush.bf16.msra.mxu3 %v3243_v9 }
  0x9f   : > { %v3141_v43 = vpop.f32.mrf.mxu0 }
  0xa5   : > { %v3207_v41 = vpop.f32.mrf.mxu1 }
  0xa7   : > { %v3202_v33 = vpop.f32.mrf.mxu0 }
  0xa8   : > { %4147 = vst [vmem:[#allocation37_spill] sm:$0xff] %v3202_v33  ;;  %v3281_v33 = vor.u32 %v2478_v26, %v2294_v12  ;;  %v2160_v12 = vld [vmem:[%s3980_s4 + $0x30] sm:$0xf0]  ;;  %v3302_v26 = vld [vmem:[#allocation3 + $0x8] sm:$0xff] }
  0xa9   : > { %4157 = vst [vmem:[#allocation47_spill] sm:$0xff] %v3302_v26  ;;  %v3311_v38 = vpack.c.bf16 %v3302_v26, %v3302_v26  ;;  %v2142_v26 = vld [vmem:[%s3980_s4] sm:$0xf] }
  0xaa   : > { %4155 = vst [vmem:[#allocation45_spill] sm:$0xff] %v3281_v33  ;;  %1093 = vmatpush.bf16.msra.mxu3 %v3281_v33  ;;  %v2474_v33 = vld [vmem:[%s3980_s4 + $0x114] sm:$0xf0] }
  0xab   : > { %1043 = vmatmul.bf16.vlgmr.msrb.gmra.mxu3 %v3311_v38 }
  0xad   : > { %v3283_v9 = vpop.f32.mrf.mxu1 }
  0xae   : > { %4156 = vst [vmem:[#allocation46_spill] sm:$0xff] %v3283_v9  ;;  %v3307_v9 = vor.u32 %v2443_v57, %v2160_v12  ;;  %v3325_v12 = vor.u32 %v2474_v33, %v2278_v50  ;;  %v3340_v33 = vor.u32 %v2441_v62, %v2142_v26  ;;  %v2320_v50 = vld [vmem:[%s3980_s4 + $0x170] sm:$0xf0]  ;;  %v2262_v62 = vld [vmem:[%s3980_s4 + $0xe8] sm:$0xf] }
  0xaf   : > { %v3278_v27 = vpop.f32.mrf.mxu0  ;;  %v2470_v26 = vld [vmem:[%s3980_s4 + $0xf4] sm:$0xf0] }
  0xb0   : > { %4154 = vst [vmem:[#allocation44_spill] sm:$0xff] %v3278_v27  ;;  %v2487_v27 = vld [vmem:[%s3980_s4 + $0x184] sm:$0xf]  ;;  %1054 = vmatpush.bf16.msra.mxu0 %v3307_v9  ;;  %1094 = vmatpush.bf16.msra.mxu3 %v3325_v12 }
  0xb1   : > { %4158 = vst [vmem:[#allocation48_spill] sm:$0xff] %v3307_v9  ;;  %v3323_v57 = vor.u32 %v2487_v27, %v2336_v46  ;;  %v2144_v27 = vld [vmem:[%s3980_s4 + $0x10] sm:$0xf0]  ;;  %v2483_v46 = vld [vmem:[%s3980_s4 + $0x164] sm:$0xf]  ;;  %1029 = vmatpush.bf16.msrb.mxu2 %v3340_v33 }
  0xb2   : > { %4160 = vst [vmem:[#allocation50_spill] sm:$0xff] %v3325_v12  ;;  %v3352_v23 = vor.u32 %v2439_v42, %v2144_v27  ;;  %v3354_v4 = vor.u32 %v2483_v46, %v2320_v50  ;;  %v2468_v12 = vld [vmem:[%s3980_s4 + $0xec] sm:$0xf]  ;;  %v3368_v42 = vor.u32 %v2470_v26, %v2262_v62  ;;  %v2264_v27 = vld [vmem:[%s3980_s4 + $0xf8] sm:$0xf0] }
  0xb3   : > { %4159 = vst [vmem:[#allocation49_spill] sm:$0xff] %v3323_v57  ;;  %1064 = vmatpush.bf16.msra.mxu1 %v3323_v57  ;;  %v3376_v50 = vor.u32 %v2468_v12, %v2264_v27  ;;  %v2304_v62 = vld [vmem:[%s3980_s4 + $0x150] sm:$0xf0]  ;;  %v2246_v26 = vld [vmem:[%s3980_s4 + $0xc8] sm:$0xf] }
  0xb4   : > { %1197 = vmatpush.bf16.msrb.mxu3 %v2783_v15  ;;  %4161 = vst [vmem:[#allocation51_spill] sm:$0xff] %v3352_v23  ;;  %1055 = vmatpush.bf16.msra.mxu0 %v3352_v23  ;;  %v2466_v27 = vld [vmem:[%s3980_s4 + $0xd4] sm:$0xf0]  ;;  %v2248_v15 = vld [vmem:[%s3980_s4 + $0xd8] sm:$0xf0] }
  0xb5   : > { %4162 = vst [vmem:[#allocation52_spill] sm:$0xff] %v3354_v4  ;;  %v3373_v46 = vpop.f32.mrf.mxu1  ;;  %1074 = vmatpush.bf16.msra.mxu2 %v3368_v42  ;;  %v3402_v61 = vor.u32 %v2466_v27, %v2246_v26  ;;  %v2460_v26 = vld [vmem:[%s3980_s4 + $0xac] sm:$0xf]  ;;  %v2232_v27 = vld [vmem:[%s3980_s4 + $0xb8] sm:$0xf0] }
  0xb6   : > { %4164 = vst [vmem:[#allocation54_spill] sm:$0xff] %v3373_v46  ;;  %v2464_v46 = vld [vmem:[%s3980_s4 + $0xcc] sm:$0xf]  ;;  %v3432_v52 = vor.u32 %v2460_v26, %v2232_v27  ;;  %v2272_v57 = vld [vmem:[%s3980_s4 + $0x110] sm:$0xf0] }
  0xb7   : > { %v3365_v63 = vpop.f32.mrf.mxu0  ;;  %4165 = vst [vmem:[#allocation55_spill] sm:$0xff] %v3376_v50  ;;  %1065 = vmatpush.bf16.msra.mxu1 %v3354_v4  ;;  %v3404_v55 = vor.u32 %v2464_v46, %v2248_v15  ;;  %v2462_v46 = vld [vmem:[%s3980_s4 + $0xb4] sm:$0xf0]  ;;  %v2456_v27 = vld [vmem:[%s3980_s4 + $0x8c] sm:$0xf] }
  0xb8   : > { %4163 = vst [vmem:[#allocation53_spill] sm:$0xff] %v3365_v63  ;;  %v2479_v63 = vld [vmem:[%s3980_s4 + $0x144] sm:$0xf]  ;;  %1100 = vmatpush.bf16.msrb.mxu0 %v3376_v50  ;;  %1198 = vmatpush.bf16.msrb.mxu3 %v2800_v20  ;;  %v2230_v20 = vld [vmem:[%s3980_s4 + $0xa8] sm:$0xf] }
  0xb9   : > { %v3391_v12 = vor.u32 %v2479_v63, %v2304_v62  ;;  %4167 = vst [vmem:[#allocation57_spill] sm:$0xff] %v3404_v55  ;;  %1075 = vmatpush.bf16.msra.mxu2 %v3402_v61  ;;  %v2475_v63 = vld [vmem:[%s3980_s4 + $0x124] sm:$0xf]  ;;  %v2288_v62 = vld [vmem:[%s3980_s4 + $0x130] sm:$0xf0]  ;;  %v3430_v4 = vor.u32 %v2462_v46, %v2230_v20 }
  0xba   : > { %v3419_v15 = vor.u32 %v2475_v63, %v2288_v62  ;;  %4169 = vst [vmem:[#allocation59_spill] sm:$0xff] %v3432_v52  ;;  %v2214_v20 = vld [vmem:[%s3980_s4 + $0x88] sm:$0xf]  ;;  %v2458_v26 = vld [vmem:[%s3980_s4 + $0x94] sm:$0xf0] }
  0xbb   : > { %4166 = vst [vmem:[#allocation56_spill] sm:$0xff] %v3391_v12  ;;  %1066 = vmatpush.bf16.msra.mxu1 %v3391_v12  ;;  %1095 = vmatmul.bf16.vlgmr.msra.gmra.mxu3 %v3311_v38 }
  0xbc   : > { %1101 = vmatpush.bf16.msrb.mxu0 %v3404_v55  ;;  %1199 = vmatpush.bf16.msrb.mxu3 %v2824_v29  ;;  %4168 = vst [vmem:[#allocation58_spill] sm:$0xff] %v3419_v15  ;;  %v2471_v29 = vld [vmem:[%s3980_s4 + $0x104] sm:$0xf] }
  0xbd   : > { %v3435_v62 = vpop.f32.mrf.mxu1  ;;  %1076 = vmatpush.bf16.msra.mxu2 %v3430_v4 }
  0xbe   : > { %4170 = vst [vmem:[#allocation60_spill] sm:$0xff] %v3435_v62 }
  0xbf   : > { %v573_v12 = vpop.f32.mrf.mxu0  ;;  %1067 = vmatpush.bf16.msra.mxu1 %v3419_v15  ;;  %v3459_v15 = vor.u32 %v2458_v26, %v2214_v20  ;;  %v2454_v26 = vld [vmem:[%s3980_s4 + $0x74] sm:$0xf0] }
  0xc0   : > { %v610_v63 = vadd.f32 %v573_v12, %v3207_v41  ;;  %1102 = vmatpush.bf16.msrb.mxu0 %v3432_v52  ;;  %1200 = vmatpush.bf16.msrb.mxu3 %v2856_v40  ;;  %v3450_v12 = vor.u32 %v2471_v29, %v2272_v57  ;;  %v2500_v29 = vld [vmem:[%s3980_s4 + $0x1ec] sm:$0xf]  ;;  %v2392_v57 = vld [vmem:[%s3980_s4 + $0x1f8] sm:$0xf0] }
  0xc1   : > { %1077 = vmatpush.bf16.msra.mxu2 %v3459_v15 }
  0xc2   : > { %v2139_v46 = vmul.f32 -1.442695, %v610_v63  ;;  %v560_v41 = vpop.f32.mrf.mxu3  ;;  %4171 = vst [vmem:[#allocation61_spill] sm:$0xff] %v3450_v12  ;;  %v2216_v63 = vld [vmem:[%s3980_s4 + $0x98] sm:$0xf0] }
  0xc3   : > { %v590_v62 = vadd.f32 %v560_v41, %v3141_v43  ;;  %v3471_v40 = vor.u32 %v2456_v27, %v2216_v63  ;;  %v3473_v43 = vor.u32 %v2500_v29, %v2392_v57  ;;  %1068 = vmatpush.bf16.msra.mxu1 %v3450_v12  ;;  %v2198_v41 = vld [vmem:[%s3980_s4 + $0x68] sm:$0xf]  ;;  %v2200_v27 = vld [vmem:[%s3980_s4 + $0x78] sm:$0xf0]  ;;  %v2496_v63 = vld [vmem:[%s3980_s4 + $0x1cc] sm:$0xf] }
  0xc4   : > { %2547 = vpow2.f32 %v2139_v46  ;;  %v3485_v46 = vor.u32 %v2454_v26, %v2198_v41  ;;  %1201 = vmatpush.bf16.msrb.mxu3 %v2895_v54  ;;  %v2376_v41 = vld [vmem:[%s3980_s4 + $0x1d8] sm:$0xf0]  ;;  %v2492_v12 = vld [vmem:[%s3980_s4 + $0x1ac] sm:$0xf] }
  0xc5   : > { %4172 = vst [vmem:[#allocation62_spill] sm:$0xff] %v3471_v40  ;;  %v2138_v20 = vmul.f32 -1.442695, %v590_v62  ;;  %1103 = vmatpush.bf16.msrb.mxu0 %v3471_v40  ;;  %v2452_v62 = vld [vmem:[%s3980_s4 + $0x6c] sm:$0xf]  ;;  %v3502_v26 = vpop.f32.mrf.mxu1  ;;  %v3533_v10 = vor.u32 %v2492_v12, %v2360_v47 }
  0xc6   : > { %4173 = vst [vmem:[#allocation63_spill] sm:$0xff] %v3473_v43  ;;  %v3497_v57 = vor.u32 %v2452_v62, %v2200_v27  ;;  %1069 = vmatmul.bf16.vlgmr.msra.gmra.mxu1 %v3311_v38  ;;  %1078 = vmatpush.bf16.msra.mxu2 %v3485_v46  ;;  %v2450_v62 = vld [vmem:[%s3980_s4 + $0x54] sm:$0xf0]  ;;  %v2448_v27 = vld [vmem:[%s3980_s4 + $0x4c] sm:$0xf] }
  0xc7   : > { %1113 = vmatpush.bf16.msrb.mxu1 %v3473_v43  ;;  %4174 = vst [vmem:[#allocation64_spill] sm:$0xff] %v3485_v46  ;;  %2549 = vpow2.f32 %v2138_v20  ;;  %v575_v29 = vpop.f32.mrf.mxu0  ;;  %v3504_v43 = vor.u32 %v2496_v63, %v2376_v41  ;;  %v2182_v20 = vld [vmem:[%s3980_s4 + $0x48] sm:$0xf]  ;;  %v2184_v41 = vld [vmem:[%s3980_s4 + $0x58] sm:$0xf0] }
  0xc8   : > { %4175 = vst [vmem:[#allocation65_spill] sm:$0xff] %v3497_v57  ;;  %v3519_v63 = vor.u32 %v2450_v62, %v2182_v20  ;;  %1202 = vmatpush.bf16.msrb.mxu3 %v2924_v0  ;;  %v2444_v47 = vld [vmem:[%s3980_s4 + $0x2c] sm:$0xf]  ;;  %v2344_v0 = vld [vmem:[%s3980_s4 + $0x198] sm:$0xf0] }
  0xc9   : > { %4176 = vst [vmem:[#allocation66_spill] sm:$0xff] %v3504_v43  ;;  %1104 = vmatpush.bf16.msrb.mxu0 %v3497_v57 }
  0xca   : > { %v2548_v29 = vpop.eup %2547  ;;  %v562_v54 = vpop.f32.mrf.mxu3  ;;  %4177 = vst [vmem:[#allocation67_spill] sm:$0xff] %v3519_v63  ;;  %1079 = vmatpush.bf16.msra.mxu2 %v3519_v63 }
  0xcb   : > { %1114 = vmatpush.bf16.msrb.mxu1 %v3504_v43  ;;  %v3531_v54 = vor.u32 %v2448_v27, %v2184_v41  ;;  %4179 = vst [vmem:[#allocation69_spill] sm:$0xff] %v3533_v10  ;;  %v3535_v62 = vadd.f32 1.0, %v2548_v29  ;;  %v2166_v43 = vld [vmem:[%s3980_s4 + $0x28] sm:$0xf]  ;;  %v2446_v27 = vld [vmem:[%s3980_s4 + $0x34] sm:$0xf0] }
  0xcc   : > { %1203 = vmatpush.bf16.msrb.mxu3 %v2959_v13  ;;  %v3550_v12 = vor.u32 %v2446_v27, %v2166_v43  ;;  %v2168_v29 = vld [vmem:[%s3980_s4 + $0x38] sm:$0xf0]  ;;  %v2488_v41 = vld [vmem:[%s3980_s4 + $0x18c] sm:$0xf]  ;;  %v2150_v13 = vld [vmem:[%s3980_s4 + $0x8] sm:$0xf] }
  0xcd   : > { %4178 = vst [vmem:[#allocation68_spill] sm:$0xff] %v3531_v54  ;;  %v2550_v20 = vpop.eup %2549  ;;  %1105 = vmatpush.bf16.msrb.mxu0 %v3531_v54  ;;  %v3563_v43 = vor.u32 %v2444_v47, %v2168_v29  ;;  %v3565_v27 = vor.u32 %v2488_v41, %v2344_v0  ;;  %v2152_v47 = vld [vmem:[%s3980_s4 + $0x18] sm:$0xf0]  ;;  %v2484_v29 = vld [vmem:[%s3980_s4 + $0x16c] sm:$0xf]  ;;  %vm620_vm6 = vweird.f32 %v3535_v62 }
  0xce   : > { %v594_v45 = vadd.f32 1.0, %v2550_v20  ;;  %4180 = vst [vmem:[#allocation70_spill] sm:$0xff] %v3550_v12  ;;  %v588_v20 = vpop.f32.mrf.mxu1  ;;  %1080 = vmatpush.bf16.msra.mxu2 %v3550_v12  ;;  %v2328_v41 = vld [vmem:[%s3980_s4 + $0x178] sm:$0xf0] }
  0xcf   : > { %1115 = vmatpush.bf16.msrb.mxu1 %v3533_v10  ;;  %4181 = vst [vmem:[#allocation71_spill] sm:$0xff] %v3563_v43  ;;  %v2442_v20 = vld [vmem:[%s3980_s4 + $0x14] sm:$0xf0]  ;;  %v2440_v10 = vld [vmem:[%s3980_s4 + $0xc] sm:$0xf] }
  0xd0   : > { %2551 = vrcp.f32 %v594_v45  ;;  %4182 = vst [vmem:[#allocation72_spill] sm:$0xff] %v3565_v27  ;;  %v3576_v63 = vor.u32 %v2442_v20, %v2150_v13  ;;  %v3583_v0 = vor.u32 %v2440_v10, %v2152_v47  ;;  %1204 = vmatpush.bf16.msrb.mxu3 %v2992_v28  ;;  %v3592_v13 = vor.u32 %v2484_v29, %v2328_v41  ;;  %v2480_v10 = vld [vmem:[%s3980_s4 + $0x14c] sm:$0xf]  ;;  %v2312_v47 = vld [vmem:[%s3980_s4 + $0x158] sm:$0xf0] }
  0xd1   : > { %2553 = vrcp.f32 %v3535_v62  ;;  %1106 = vmatpush.bf16.msrb.mxu0 %v3563_v43  ;;  %v3604_v29 = vor.u32 %v2480_v10, %v2312_v47  ;;  %v606_v28 = vand.u32 2147483648, %v594_v45  ;;  %v604_v46 = vand.u32 2147483647, %v594_v45 }
  0xd2   : > { %4183 = vst [vmem:[#allocation73_spill] sm:$0xff] %v3576_v63  ;;  %1081 = vmatpush.bf16.msra.mxu2 %v3576_v63  ;;  %v2476_v63 = vld [vmem:[%s3980_s4 + $0x12c] sm:$0xf]  ;;  %vm600_vm2 = vweird.f32 %v594_v45 }
  0xd3   : > { %1116 = vmatpush.bf16.msrb.mxu1 %v3565_v27  ;;  %4184 = vst [vmem:[#allocation74_spill] sm:$0xff] %v3583_v0  ;;  %v3615_v10 = vor.u32 %v2476_v63, %v2296_v6  ;;  %vm605_vm4 = vcmp.eq.f32.partialorder %v604_v46, 8.507059e+37 }
  0xd4   : > { %4185 = vst [vmem:[#allocation75_spill] sm:$0xff] %v3592_v13  ;;  %1297 = vmatpush.bf16.msra.mxu3 %v3109_v22 }
  0xd5   : > { %1107 = vmatpush.bf16.msrb.mxu0 %v3583_v0  ;;  %4186 = vst [vmem:[#allocation76_spill] sm:$0xff] %v3604_v29 }
  0xd6   : > { %v2552_v20 = vpop.eup %2551  ;;  %4187 = vst [vmem:[#allocation77_spill] sm:$0xff] %v3615_v10 }
  0xd7   : > { %v2554_v27 = vpop.eup %2553  ;;  %v596_v12 = vmul.f32 %v2552_v20, %v594_v45  ;;  %1117 = vmatpush.bf16.msrb.mxu1 %v3592_v13  ;;  %vm601_vm1 = vweird.f32 %v2552_v20  ;;  %v2472_v13 = vld [vmem:[%s3980_s4 + $0x10c] sm:$0xf] }
  0xd8   : > { %1298 = vmatpush.bf16.msra.mxu3 %v3129_v36  ;;  %v616_v22 = vmul.f32 %v2554_v27, %v3535_v62  ;;  %vm602_vm3 = vmor %vm600_vm2, %vm601_vm1  ;;  %v607_v36 = vor.u32 1.1754944e-38, %v606_v28  ;;  %vm621_vm5 = vweird.f32 %v2554_v27 }
  0xd9   : > { %v597_v41 = vsub.f32 1.0, %v596_v12  ;;  %vm622_vm7 = vmor %vm620_vm6, %vm621_vm5 }
  0xda   : > { %v617_v47 = vsub.f32 1.0, %v616_v22  ;;  %v356_v22 = vpop.f32.mrf.mxu2 }
  0xdb   : > { %v598_v34 = vmul.f32 %v2552_v20, %v597_v41  ;;  %1118 = vmatpush.bf16.msrb.mxu1 %v3604_v29  ;;  %v2280_v41 = vld [vmem:[%s3980_s4 + $0x118] sm:$0xf0] }
  0xdc   : > { %1299 = vmatpush.bf16.msra.mxu3 %v3165_v59  ;;  %v3625_v6 = vor.u32 %v2472_v13, %v2280_v41  ;;  %v618_v28 = vmul.f32 %v2554_v27, %v617_v47  ;;  %v1170_v41 = vstv %s3648_s13 }
  0xdd   : > { %v599_v12 = vadd.f32 %v2552_v20, %v598_v34 }
  0xde   : > { %4188 = vst [vmem:[#allocation78_spill] sm:$0xff] %v3625_v6  ;;  %v619_v46 = vadd.f32 %v2554_v27, %v618_v28  ;;  %v4189_v28 = vld [vmem:[#allocation74_spill] sm:$0xff] }
  0xdf   : > { %v603_v0 = vsel %vm602_vm3, %v2552_v20, %v599_v12  ;;  %1119 = vmatpush.bf16.msrb.mxu1 %v3615_v10 }
  0xe0   : > { %v608_v34 = vsel %vm605_vm4, %v607_v36, %v603_v0  ;;  %1300 = vmatpush.bf16.msra.mxu3 %v3192_v18  ;;  %v626_v36 = vand.u32 2147483648, %v3535_v62  ;;  %v623_v0 = vsel %vm622_vm7, %v2554_v27, %v619_v46  ;;  %v4192_v46 = vld [vmem:[#allocation40_spill] sm:$0xff] }
  0xe1   : > { %v630_v45 = vmul.f32 %v608_v34, %v3502_v26  ;;  %v624_v26 = vand.u32 2147483647, %v3535_v62  ;;  %v4067_v34 = vmov 0  }
  0xe2   : > { %v627_v20 = vor.u32 1.1754944e-38, %v626_v36  ;;  %2545 = vset.pattern.permute.xlu0 %v4067_v34  ;;  %2546 = vset.pattern.permute.xlu1 %v4067_v34  ;;  %v4193_v36 = vld [vmem:[#allocation67_spill] sm:$0xff] }
  0xe3   : > { %v631_v63 = vadd.f32 %v630_v45, %v356_v22  ;;  %1120 = vmatpush.bf16.msrb.mxu1 %v3625_v6  ;;  %vm625_vm8 = vcmp.eq.f32.partialorder %v624_v26, 8.507059e+37  ;;  %v4190_v22 = vld [vmem:[#allocation64_spill] sm:$0xff] }
  0xe4   : > { %1301 = vmatpush.bf16.msra.mxu3 %v3232_v3  ;;  %v4194_v26 = vld [vmem:[#allocation24_spill] sm:$0xff] }
  0xe5   : > { %2555 = vtanh.f32 %v631_v63  ;;  %v4191_v63 = vld [vmem:[#allocation21_spill] sm:$0xff] }
  0xe6   : > { %1121 = vmatmul.bf16.vlgmr.msrb.gmra.mxu1 %v3311_v38  ;;  %v628_v38 = vsel %vm625_vm8, %v627_v20, %v623_v0  ;;  %v4195_v0 = vld [vmem:[#allocation43_spill] sm:$0xff]  ;;  %v4197_v20 = vld [vmem:[#allocation25_spill] sm:$0xff] }
  0xe7   : > { %1271 = vmatpush.bf16.msra.mxu1 %v3098_v11 }
  0xe8   : > { %1302 = vmatpush.bf16.msra.mxu3 %v3268_v2 }
  0xeb   : > { %1272 = vmatpush.bf16.msra.mxu1 %v3123_v32  ;;  %v2556_v13 = vpop.eup %2555 }
  0xec   : > { %v633_v12 = vsub.f32 %v2964_v17, %v2556_v13  ;;  %1303 = vmatpush.bf16.msra.mxu3 %v3307_v9  ;;  %v3652_v17 = vld [vmem:[%s2736_s6] sm:$0xff] }
  0xed   : > { %vm1171_vm9 = vcmp.eq.s32.totalorder %v3652_v17, %v1170_v41  ;;  %v4202_v41 = vld [vmem:[#allocation27_spill] sm:$0xff] }
  0xee   : > { %v634_v47 = vmul.f32 %v633_v12, %v628_v38  ;;  %v1172_v45 = vsel %vm1171_vm9, 1, %v4067_v34  ;;  %v4198_v12 = vld [vmem:[#allocation49_spill] sm:$0xff]  ;;  %v4204_v34 = vld [vmem:[#allocation28_spill] sm:$0xff] }
  0xef   : > { %1273 = vmatpush.bf16.msra.mxu1 %v3154_v51  ;;  %1174 = vperm.xlu0 %2545, %v1172_v45   ;;  %v4199_v38 = vld [vmem:[#allocation73_spill] sm:$0xff]  ;;  %v4203_v45 = vld [vmem:[#allocation56_spill] sm:$0xff] }
  0xf0   : > { %v3641_v62 = vadd.f32 %v2556_v13, %v634_v47  ;;  %1304 = vmatpush.bf16.msra.mxu3 %v3352_v23  ;;  %v4196_v13 = vld [vmem:[#allocation70_spill] sm:$0xff] }
  0xf1   : > { %v4200_v47 = vld [vmem:[#allocation26_spill] sm:$0xff] }
  0xf2   : > { %v636_v27 = vpack.c.bf16 %v3641_v62, %v3641_v62 }
  0xf3   : > { %1274 = vmatpush.bf16.msra.mxu1 %v3181_v7 }
  0xf4   : > { %1030 = vmatmul.bf16.vlgmr.msrb.gmra.mxu2 %v636_v27  ;;  %1056 = vmatmul.bf16.vlgmr.msra.gmra.mxu0 %v636_v27 }
  0xf5   : > { %1205 = vmatmul.bf16.vlgmr.msrb.gmra.mxu3 %v636_v27  ;;  %1184 = vmatpush.bf16.msrb.mxu2 %v2764_v8 }
  0xf6   : > { %1210 = vmatpush.bf16.msra.mxu0 %v2847_v37  ;;  %1349 = vmatpush.bf16.msrb.mxu3 %v3376_v50 }
  0xf7   : > { %1275 = vmatpush.bf16.msra.mxu1 %v3221_v53 }
  0xf9   : > { %1185 = vmatpush.bf16.msrb.mxu2 %v2781_v14 }
  0xfa   : > { %1211 = vmatpush.bf16.msra.mxu0 %v2878_v48  ;;  %1350 = vmatpush.bf16.msrb.mxu3 %v3404_v55 }
  0xfb   : > { %1276 = vmatpush.bf16.msra.mxu1 %v3257_v49 }
  0xfd   : > { %1186 = vmatpush.bf16.msrb.mxu2 %v2803_v21 }
  0xfe   : > { %1212 = vmatpush.bf16.msra.mxu0 %v2910_v60  ;;  %1351 = vmatpush.bf16.msrb.mxu3 %v3432_v52 }
  0xff   : > { %1277 = vmatpush.bf16.msra.mxu1 %v3297_v58 }
 0x101   : > { %1187 = vmatpush.bf16.msrb.mxu2 %v2827_v30 }
 0x102   : > { %1213 = vmatpush.bf16.msra.mxu0 %v2939_v5  ;;  %1352 = vmatpush.bf16.msrb.mxu3 %v3471_v40  ;;  %v4216_v40 = vld [vmem:[#allocation38_spill] sm:$0xff] }
 0x103   : > { %1278 = vmatpush.bf16.msra.mxu1 %v3340_v33 }
 0x104   : > { %1082 = vmatmul.bf16.vlgmr.msra.gmra.mxu2 %v636_v27  ;;  %1108 = vmatmul.bf16.vlgmr.msrb.gmra.mxu0 %v636_v27 }
 0x105   : > { %1188 = vmatpush.bf16.msrb.mxu2 %v2866_v44 }
 0x106   : > { %1214 = vmatpush.bf16.msra.mxu0 %v2973_v19  ;;  %1353 = vmatpush.bf16.msrb.mxu3 %v3497_v57  ;;  %v4208_v57 = vld [vmem:[#allocation61_spill] sm:$0xff] }
 0x107   : > { %1323 = vmatpush.bf16.msrb.mxu1 %v3368_v42 }
 0x109   : > { %1189 = vmatpush.bf16.msrb.mxu2 %v2898_v56 }
 0x10a   : > { %1215 = vmatpush.bf16.msra.mxu0 %v2998_v31  ;;  %1354 = vmatpush.bf16.msrb.mxu3 %v3531_v54  ;;  %v4207_v54 = vld [vmem:[#allocation30_spill] sm:$0xff] }
 0x10b   : > { %1324 = vmatpush.bf16.msrb.mxu1 %v3402_v61 }
 0x10d   : > { %1190 = vmatpush.bf16.msrb.mxu2 %v2927_v1  ;;  %v4224_v1 = vld [vmem:[#allocation37_spill] sm:$0xff] }
 0x10e   : > { %1216 = vmatpush.bf16.msra.mxu0 %v3011_v35  ;;  %1355 = vmatpush.bf16.msrb.mxu3 %v3563_v43  ;;  %v4206_v43 = vld [vmem:[#allocation29_spill] sm:$0xff] }
 0x10f   : > { %1325 = vmatpush.bf16.msrb.mxu1 %v3430_v4 }
 0x111   : > { %1191 = vmatpush.bf16.msrb.mxu2 %v2962_v16 }
 0x112   : > { %1217 = vmatpush.bf16.msra.mxu0 %v3021_v39  ;;  %1356 = vmatpush.bf16.msrb.mxu3 %v4189_v28  ;;  %v4205_v28 = vld [vmem:[#allocation58_spill] sm:$0xff] }
 0x113   : > { %1326 = vmatpush.bf16.msrb.mxu1 %v3459_v15 }
 0x114   : > { %1192 = vmatmul.bf16.vlgmr.msrb.gmra.mxu2 %v636_v27 }
 0x115   : > { %1284 = vmatpush.bf16.msra.mxu2 %v2981_v24  ;;  %1218 = vmatmul.bf16.vlgmr.msra.gmra.mxu0 %v636_v27  ;;  %v4201_v27 = vld [vmem:[#allocation52_spill] sm:$0xff] }
 0x116   : > { %1310 = vmatpush.bf16.msrb.mxu0 %v3194_v25 }
 0x117   : > { %1327 = vmatpush.bf16.msrb.mxu1 %v4190_v22 }
 0x119   : > { %1285 = vmatpush.bf16.msra.mxu2 %v4191_v63 }
 0x11a   : > { %1311 = vmatpush.bf16.msrb.mxu0 %v4192_v46 }
 0x11b   : > { %1328 = vmatpush.bf16.msrb.mxu1 %v4193_v36 }
 0x11d   : > { %1286 = vmatpush.bf16.msra.mxu2 %v4194_v26 }
 0x11e   : > { %1312 = vmatpush.bf16.msrb.mxu0 %v4195_v0 }
 0x11f   : > { %1329 = vmatpush.bf16.msrb.mxu1 %v4196_v13 }
 0x121   : > { %1287 = vmatpush.bf16.msra.mxu2 %v4197_v20  ;;  %v4210_v20 = vld [vmem:[#allocation32_spill] sm:$0xff] }
 0x122   : > { %1313 = vmatpush.bf16.msrb.mxu0 %v4198_v12  ;;  %v4209_v12 = vld [vmem:[#allocation63_spill] sm:$0xff] }
 0x123   : > { %1330 = vmatpush.bf16.msrb.mxu1 %v4199_v38 }
 0x125   : > { %1288 = vmatpush.bf16.msra.mxu2 %v4200_v47  ;;  %v4211_v47 = vld [vmem:[#allocation66_spill] sm:$0xff] }
 0x126   : > { %1314 = vmatpush.bf16.msrb.mxu0 %v4201_v27 }
 0x129   : > { %1289 = vmatpush.bf16.msra.mxu2 %v4202_v41  ;;  %v4212_v41 = vld [vmem:[#allocation34_spill] sm:$0xff] }
 0x12a   : > { %1315 = vmatpush.bf16.msrb.mxu0 %v4203_v45  ;;  %v4213_v45 = vld [vmem:[#allocation69_spill] sm:$0xff] }
 0x12d   : > { %1290 = vmatpush.bf16.msra.mxu2 %v4204_v34  ;;  %v4214_v34 = vld [vmem:[#allocation35_spill] sm:$0xff] }
 0x12e   : > { %1316 = vmatpush.bf16.msrb.mxu0 %v4205_v28  ;;  %v1044_v27 = vpop.f32.mrf.mxu3  ;;  %v4215_v28 = vld [vmem:[#allocation72_spill] sm:$0xff] }
 0x131   : > { %1291 = vmatpush.bf16.msra.mxu2 %v4206_v43 }
 0x132   : > { %1317 = vmatpush.bf16.msrb.mxu0 %v4208_v57  ;;  %v4218_v57 = vld [vmem:[#allocation41_spill] sm:$0xff] }
 0x135   : > { %1336 = vmatpush.bf16.msrb.mxu2 %v4207_v54  ;;  %v4217_v54 = vld [vmem:[#allocation75_spill] sm:$0xff] }
 0x136   : > { %1362 = vmatpush.bf16.msra.mxu0 %v4209_v12  ;;  %v1046_v43 = vpop.f32.mrf.mxu3 }
 0x139   : > { %1337 = vmatpush.bf16.msrb.mxu2 %v4210_v20 }
 0x13a   : > { %1363 = vmatpush.bf16.msra.mxu0 %v4211_v47  ;;  %v4219_v47 = vld [vmem:[#allocation45_spill] sm:$0xff] }
 0x13d   : > { %1338 = vmatpush.bf16.msrb.mxu2 %v4212_v41  ;;  %v4220_v41 = vld [vmem:[#allocation50_spill] sm:$0xff] }
 0x13e   : > { %1364 = vmatpush.bf16.msra.mxu0 %v4213_v45  ;;  %v1096_v20 = vpop.f32.mrf.mxu3  ;;  %v3726_v45 = vpop.f32.mrf.mxu2 }
 0x141   : > { %1339 = vmatpush.bf16.msrb.mxu2 %v4214_v34 }
 0x142   : > { %1365 = vmatpush.bf16.msra.mxu0 %v4215_v28 }
 0x143   : > { %v1070_v28 = vpop.f32.mrf.mxu1 }
 0x145   : > { %1340 = vmatpush.bf16.msrb.mxu2 %v4216_v40 }
 0x146   : > { %1366 = vmatpush.bf16.msra.mxu0 %v4217_v54  ;;  %v1098_v34 = vpop.f32.mrf.mxu3  ;;  %v3728_v54 = vpop.f32.mrf.mxu2 }
 0x147   : > { %4221 = vst [vmem:[#allocation79_spill] sm:$0xff] %v3728_v54 }
 0x149   : > { %1341 = vmatpush.bf16.msrb.mxu2 %v4218_v57 }
 0x14a   : > { %1367 = vmatpush.bf16.msra.mxu0 %v3604_v29 }
 0x14b   : > { %v1072_v43 = vpop.f32.mrf.mxu1 }
 0x14d   : > { %1342 = vmatpush.bf16.msrb.mxu2 %v4219_v47 }
 0x14e   : > { %1368 = vmatpush.bf16.msra.mxu0 %v3615_v10  ;;  %v3730_v12 = vpop.f32.mrf.mxu2 }
 0x14f   : > { %4222 = vst [vmem:[#allocation80_spill] sm:$0xff] %v3730_v12 }
 0x151   : > { %1343 = vmatpush.bf16.msrb.mxu2 %v4220_v41 }
 0x152   : > { %1369 = vmatpush.bf16.msra.mxu0 %v3625_v6 }
 0x163   : > { %v1122_v40 = vpop.f32.mrf.mxu1 }
 0x16b   : > { %v1124_v57 = vpop.f32.mrf.mxu1 }
 0x171   : > { %v1057_v29 = vpop.f32.mrf.mxu0 }
 0x172   : > { %v1071_v0 = vadd.f32 %v1070_v28, %v1057_v29 }
 0x174   : > { %v2397_v47 = vmul.f32 -1.442695, %v1071_v0 }
 0x176   : > { %2557 = vpow2.f32 %v2397_v47 }
 0x177   : > { %v1031_v26 = vpop.f32.mrf.mxu2 }
 0x178   : > { %v1045_v10 = vadd.f32 %v1044_v27, %v1031_v26  ;;  %v1206_v52 = vpop.f32.mrf.mxu3 }
 0x179   : > { %v1059_v41 = vpop.f32.mrf.mxu0 }
 0x17a   : > { %v2396_v6 = vmul.f32 -1.442695, %v1045_v10 }
 0x17c   : > { %2559 = vpow2.f32 %v2396_v6  ;;  %v2558_v34 = vpop.eup %2557 }
 0x17d   : > { %v1148_v25 = vadd.f32 1.0, %v2558_v34 }
 0x17f   : > { %v1033_v43 = vpop.f32.mrf.mxu2  ;;  %vm1154_vm15 = vweird.f32 %v1148_v25 }
 0x180   : > { %v1208_v46 = vpop.f32.mrf.mxu3  ;;  %v4223_v43 = vld [vmem:[#allocation46_spill] sm:$0xff] }
 0x181   : > { %v1109_v63 = vpop.f32.mrf.mxu0  ;;  %v1243_v46 = vadd.f32 %v1206_v52, %v4223_v43 }
 0x182   : > { %v2560_v55 = vpop.eup %2559 }
 0x183   : > { %v1129_v54 = vadd.f32 1.0, %v2560_v55  ;;  %v2399_v50 = vmul.f32 -1.442695, %v1243_v46 }
 0x185   : > { %2561 = vrcp.f32 %v1129_v54  ;;  %v1141_v47 = vand.u32 2147483648, %v1129_v54  ;;  %v1139_v6 = vand.u32 2147483647, %v1129_v54  ;;  %vm1135_vm11 = vweird.f32 %v1129_v54 }
 0x186   : > { %2563 = vrcp.f32 %v1148_v25 }
 0x187   : > { %v1083_v57 = vpop.f32.mrf.mxu2  ;;  %v1142_v39 = vor.u32 1.1754944e-38, %v1141_v47  ;;  %vm1140_vm13 = vcmp.eq.f32.partialorder %v1139_v6, 8.507059e+37  ;;  %2565 = vpow2.f32 %v2399_v50  ;;  %v4226_v47 = vld [vmem:[#allocation4_spill] sm:$0xff] }
 0x188   : > { %v1097_v23 = vadd.f32 %v1096_v20, %v1083_v57  ;;  %v4225_v57 = vld [vmem:[#allocation47_spill] sm:$0xff] }
 0x189   : > { %v1111_v12 = vpop.f32.mrf.mxu0 }
 0x18a   : > { %v1123_v12 = vadd.f32 %v1122_v40, %v1109_v63  ;;  %v1158_v40 = vand.u32 2147483647, %v1148_v25 }
 0x18b   : > { %v2562_v29 = vpop.eup %2561 }
 0x18c   : > { %v2564_v28 = vpop.eup %2563  ;;  %v1131_v0 = vmul.f32 %v2562_v29, %v1129_v54  ;;  %vm1136_vm10 = vweird.f32 %v2562_v29  ;;  %vm1159_vm1 = vcmp.eq.f32.partialorder %v1158_v40, 8.507059e+37 }
 0x18d   : > { %v1150_v27 = vmul.f32 %v2564_v28, %v1148_v25  ;;  %vm1137_vm12 = vmor %vm1135_vm11, %vm1136_vm10  ;;  %vm1155_vm14 = vweird.f32 %v2564_v28 }
 0x18e   : > { %v1132_v26 = vsub.f32 1.0, %v1131_v0  ;;  %vm1156_vm0 = vmor %vm1154_vm15, %vm1155_vm14 }
 0x18f   : > { %v1085_v41 = vpop.f32.mrf.mxu2  ;;  %v1151_v55 = vsub.f32 1.0, %v1150_v27  ;;  %v1160_v27 = vand.u32 2147483648, %v1148_v25 }
 0x190   : > { %v1133_v10 = vmul.f32 %v2562_v29, %v1132_v26 }
 0x191   : > { %v1152_v41 = vmul.f32 %v2564_v28, %v1151_v55  ;;  %v1161_v20 = vor.u32 1.1754944e-38, %v1160_v27  ;;  %v4228_v27 = vld [vmem:[#allocation6_spill] sm:$0xff] }
 0x192   : > { %v1134_v24 = vadd.f32 %v2562_v29, %v1133_v10  ;;  %v3733_v34 = vpop.f32.mrf.mxu0 }
 0x193   : > { %v1153_v10 = vadd.f32 %v2564_v28, %v1152_v41 }
 0x194   : > { %v1138_v16 = vsel %vm1137_vm12, %v2562_v29, %v1134_v24  ;;  %v2566_v24 = vpop.eup %2565 }
 0x195   : > { %v1143_v0 = vsel %vm1140_vm13, %v1142_v39, %v1138_v16  ;;  %v1157_v39 = vsel %vm1156_vm0, %v2564_v28, %v1153_v10  ;;  %v1247_v50 = vadd.f32 1.0, %v2566_v24 }
 0x196   : > { %v1164_v38 = vmul.f32 %v1143_v0, %v1123_v12  ;;  %v4227_v0 = vld [vmem:[#allocation5_spill] sm:$0xff] }
 0x197   : > { %v1193_v26 = vpop.f32.mrf.mxu2  ;;  %vm1253_vm7 = vweird.f32 %v1247_v50 }
 0x198   : > { %v1165_v35 = vadd.f32 %v1164_v38, %v1097_v23  ;;  %v1223_v13 = vadd.f32 %v1193_v26, %v4224_v1 }
 0x19a   : > { %2567 = vtanh.f32 %v1165_v35  ;;  %v2398_v52 = vmul.f32 -1.442695, %v1223_v13  ;;  %v1221_v54 = vpop.f32.mrf.mxu0  ;;  %v1162_v35 = vsel %vm1159_vm1, %v1161_v20, %v1157_v39 }
 0x19c   : > { %2569 = vpow2.f32 %v2398_v52 }
 0x19f   : > { %v1195_v16 = vpop.f32.mrf.mxu2 }
 0x1a0   : > { %v2568_v63 = vpop.eup %2567 }
 0x1a1   : > { %v1167_v23 = vsub.f32 %v4225_v57, %v2568_v63 }
 0x1a2   : > { %v2570_v1 = vpop.eup %2569 }
 0x1a3   : > { %v1227_v13 = vadd.f32 1.0, %v2570_v1  ;;  %v1168_v38 = vmul.f32 %v1167_v23, %v1162_v35  ;;  %v4230_v23 = vld [vmem:[#allocation10_spill] sm:$0xff]  ;;  %v1259_v1 = vand.u32 2147483648, %v1247_v50  ;;  %v1257_v35 = vand.u32 2147483647, %v1247_v50 }
 0x1a5   : > { %2571 = vrcp.f32 %v1227_v13  ;;  %v3737_v29 = vadd.f32 %v2568_v63, %v1168_v38  ;;  %v1239_v12 = vand.u32 2147483648, %v1227_v13  ;;  %v1237_v26 = vand.u32 2147483647, %v1227_v13  ;;  %v4229_v63 = vld [vmem:[#allocation8_spill] sm:$0xff] }
 0x1a6   : > { %2573 = vrcp.f32 %v1247_v50  ;;  %vm1233_vm3 = vweird.f32 %v1227_v13  ;;  %v1260_v38 = vor.u32 1.1754944e-38, %v1259_v1  ;;  %vm1258_vm9 = vcmp.eq.f32.partialorder %v1257_v35, 8.507059e+37  ;;  %v4245_v1 = vld [vmem:[#allocation18_spill] sm:$0xff]  ;;  %v4246_v35 = vld [vmem:[#allocation36_spill] sm:$0xff] }
 0x1a7   : > { %v1270_v25 = vpack.c.bf16 %v3737_v29, %v3737_v29  ;;  %v1240_v10 = vor.u32 1.1754944e-38, %v1239_v12  ;;  %vm1238_vm5 = vcmp.eq.f32.partialorder %v1237_v26, 8.507059e+37  ;;  %v4234_v12 = vld [vmem:[#allocation31_spill] sm:$0xff] }
 0x1a9   : > { %1292 = vmatmul.bf16.vlgmr.msra.gmra.mxu2 %v1270_v25  ;;  %1318 = vmatmul.bf16.vlgmr.msrb.gmra.mxu0 %v1270_v25 }
 0x1aa   : > { %1447 = vmatpush.bf16.msra.mxu2 %v4226_v47  ;;  %1521 = vmatpush.bf16.msrb.mxu0 %v3098_v11 }
 0x1ab   : > { %v2572_v28 = vpop.eup %2571 }
 0x1ac   : > { %v2574_v6 = vpop.eup %2573  ;;  %v1229_v43 = vmul.f32 %v2572_v28, %v1227_v13  ;;  %vm1234_vm2 = vweird.f32 %v2572_v28  ;;  %v4231_v13 = vld [vmem:[#allocation12_spill] sm:$0xff] }
 0x1ad   : > { %v1249_v55 = vmul.f32 %v2574_v6, %v1247_v50  ;;  %vm1235_vm4 = vmor %vm1233_vm3, %vm1234_vm2  ;;  %vm1254_vm6 = vweird.f32 %v2574_v6  ;;  %v4233_v50 = vld [vmem:[#allocation19_spill] sm:$0xff] }
 0x1ae   : > { %v1230_v46 = vsub.f32 1.0, %v1229_v43  ;;  %1448 = vmatpush.bf16.msra.mxu2 %v4227_v0  ;;  %1522 = vmatpush.bf16.msrb.mxu0 %v3123_v32  ;;  %vm1255_vm8 = vmor %vm1253_vm7, %vm1254_vm6  ;;  %v4232_v43 = vld [vmem:[#allocation15_spill] sm:$0xff] }
 0x1af   : > { %v1250_v54 = vsub.f32 1.0, %v1249_v55 }
 0x1b0   : > { %v1231_v41 = vmul.f32 %v2572_v28, %v1230_v46 }
 0x1b1   : > { %v1251_v39 = vmul.f32 %v2574_v6, %v1250_v54  ;;  %v4237_v54 = vld [vmem:[#allocation70_spill] sm:$0xff] }
 0x1b2   : > { %v1232_v52 = vadd.f32 %v2572_v28, %v1231_v41  ;;  %1449 = vmatpush.bf16.msra.mxu2 %v4228_v27  ;;  %1523 = vmatpush.bf16.msrb.mxu0 %v3154_v51  ;;  %v4235_v41 = vmov 0  }
 0x1b3   : > { %v1252_v57 = vadd.f32 %v2574_v6, %v1251_v39  ;;  %v4242_v39 = vld [vmem:[#allocation55_spill] sm:$0xff] }
 0x1b4   : > { %v1236_v40 = vsel %vm1235_vm4, %v2572_v28, %v1232_v52  ;;  %v4236_v52 = vld [vmem:[#allocation33_spill] sm:$0xff] }
 0x1b5   : > { %v1241_v24 = vsel %vm1238_vm5, %v1240_v10, %v1236_v40  ;;  %v4238_v10 = vld [vmem:[#allocation13_spill] sm:$0xff]  ;;  %v4239_v40 = vld [vmem:[#allocation22_spill] sm:$0xff] }
 0x1b6   : > { %v1263_v16 = vmul.f32 %v1241_v24, %v3733_v34  ;;  %1450 = vmatpush.bf16.msra.mxu2 %v4229_v63  ;;  %1524 = vmatpush.bf16.msrb.mxu0 %v3181_v7  ;;  %v1256_v34 = vsel %vm1255_vm8, %v2574_v6, %v1252_v57  ;;  %v4240_v24 = vld [vmem:[#allocation51_spill] sm:$0xff] }
 0x1b7   : > { %v1261_v28 = vsel %vm1258_vm9, %v1260_v38, %v1256_v34  ;;  %v4244_v57 = vld [vmem:[#allocation23_spill] sm:$0xff]  ;;  %v4247_v34 = vld [vmem:[#allocation57_spill] sm:$0xff]  ;;  %v4249_v38 = vld [vmem:[#allocation40_spill] sm:$0xff] }
 0x1b8   : > { %v1264_v20 = vadd.f32 %v1263_v16, %v3726_v45  ;;  %v4241_v16 = vld [vmem:[#allocation73_spill] sm:$0xff] }
 0x1b9   : > { %1344 = vmatmul.bf16.vlgmr.msrb.gmra.mxu2 %v1270_v25  ;;  %1370 = vmatmul.bf16.vlgmr.msra.gmra.mxu0 %v1270_v25 }
 0x1ba   : > { %2575 = vtanh.f32 %v1264_v20  ;;  %1451 = vmatpush.bf16.msra.mxu2 %v4230_v23  ;;  %1525 = vmatpush.bf16.msrb.mxu0 %v3221_v53  ;;  %v4243_v20 = vld [vmem:[#allocation16_spill] sm:$0xff] }
 0x1be   : > { %1452 = vmatpush.bf16.msra.mxu2 %v4231_v13  ;;  %1526 = vmatpush.bf16.msrb.mxu0 %v3257_v49 }
 0x1c0   : > { %v2576_v45 = vpop.eup %2575 }
 0x1c1   : > { %v1266_v25 = vsub.f32 %v3641_v62, %v2576_v45  ;;  %v1420_v62 = vstv %s1419_s18 }
 0x1c2   : > { %1453 = vmatpush.bf16.msra.mxu2 %v4232_v43  ;;  %1527 = vmatpush.bf16.msrb.mxu0 %v3297_v58  ;;  %vm1421_vm10 = vcmp.eq.s32.totalorder %v3652_v17, %v1420_v62  ;;  %v4253_v62 = vld [vmem:[#allocation62_spill] sm:$0xff] }
 0x1c3   : > { %v1267_v46 = vmul.f32 %v1266_v25, %v1261_v28  ;;  %v1422_v26 = vsel %vm1421_vm10, 1, %v4235_v41  ;;  %v4250_v25 = vld [vmem:[#allocation59_spill] sm:$0xff]  ;;  %v4251_v28 = vld [vmem:[#allocation24_spill] sm:$0xff] }
 0x1c4   : > { %1424 = vperm.xlu0 %2545, %v1422_v26   ;;  %v4254_v26 = vld [vmem:[#allocation25_spill] sm:$0xff] }
 0x1c5   : > { %v3758_v55 = vadd.f32 %v2576_v45, %v1267_v46  ;;  %v4248_v45 = vld [vmem:[#allocation21_spill] sm:$0xff]  ;;  %v4252_v46 = vld [vmem:[#allocation43_spill] sm:$0xff] }
 0x1c6   : > { %1454 = vmatpush.bf16.msra.mxu2 %v4233_v50  ;;  %1528 = vmatpush.bf16.msrb.mxu0 %v3340_v33 }
 0x1c7   : > { %v1269_v6 = vpack.c.bf16 %v3758_v55, %v3758_v55 }
 0x1c9   : > { %1279 = vmatmul.bf16.vlgmr.msra.gmra.mxu1 %v1269_v6  ;;  %1305 = vmatmul.bf16.vlgmr.msra.gmra.mxu3 %v1269_v6 }
 0x1ca   : > { %1547 = vmatpush.bf16.msrb.mxu2 %v4234_v12  ;;  %1573 = vmatpush.bf16.msra.mxu0 %v3368_v42 }
 0x1cb   : > { %1455 = vmatmul.bf16.vlgmr.msra.gmra.mxu2 %v1269_v6  ;;  %1434 = vmatpush.bf16.msra.mxu1 %v2764_v8 }
 0x1cc   : > { %1460 = vmatpush.bf16.msra.mxu3 %v2847_v37 }
 0x1ce   : > { %1548 = vmatpush.bf16.msrb.mxu2 %v4236_v52  ;;  %1574 = vmatpush.bf16.msra.mxu0 %v3402_v61 }
 0x1cf   : > { %1435 = vmatpush.bf16.msra.mxu1 %v2781_v14 }
 0x1d0   : > { %1461 = vmatpush.bf16.msra.mxu3 %v2878_v48 }
 0x1d2   : > { %1549 = vmatpush.bf16.msrb.mxu2 %v3165_v59  ;;  %1575 = vmatpush.bf16.msra.mxu0 %v3430_v4 }
 0x1d3   : > { %1436 = vmatpush.bf16.msra.mxu1 %v2803_v21 }
 0x1d4   : > { %1462 = vmatpush.bf16.msra.mxu3 %v2910_v60 }
 0x1d6   : > { %1550 = vmatpush.bf16.msrb.mxu2 %v3192_v18  ;;  %1576 = vmatpush.bf16.msra.mxu0 %v3459_v15 }
 0x1d7   : > { %1437 = vmatpush.bf16.msra.mxu1 %v2827_v30 }
 0x1d8   : > { %1463 = vmatpush.bf16.msra.mxu3 %v2939_v5  ;;  %v4285_v5 = vld [vmem:[#allocation44_spill] sm:$0xff] }
 0x1d9   : > { %1331 = vmatmul.bf16.vlgmr.msrb.gmra.mxu1 %v1269_v6  ;;  %1357 = vmatmul.bf16.vlgmr.msrb.gmra.mxu3 %v1269_v6 }
 0x1da   : > { %1551 = vmatpush.bf16.msrb.mxu2 %v3232_v3  ;;  %1577 = vmatpush.bf16.msra.mxu0 %v4190_v22 }
 0x1db   : > { %1438 = vmatpush.bf16.msra.mxu1 %v2866_v44 }
 0x1dc   : > { %1464 = vmatpush.bf16.msra.mxu3 %v2973_v19 }
 0x1de   : > { %1552 = vmatpush.bf16.msrb.mxu2 %v3268_v2  ;;  %1578 = vmatpush.bf16.msra.mxu0 %v4193_v36 }
 0x1df   : > { %1439 = vmatpush.bf16.msra.mxu1 %v2898_v56 }
 0x1e0   : > { %1465 = vmatpush.bf16.msra.mxu3 %v2998_v31 }
 0x1e2   : > { %1553 = vmatpush.bf16.msrb.mxu2 %v3307_v9  ;;  %1579 = vmatpush.bf16.msra.mxu0 %v4237_v54 }
 0x1e3   : > { %1440 = vmatpush.bf16.msra.mxu1 %v4238_v10 }
 0x1e4   : > { %1466 = vmatpush.bf16.msra.mxu3 %v4239_v40 }
 0x1e6   : > { %1554 = vmatpush.bf16.msrb.mxu2 %v4240_v24  ;;  %1580 = vmatpush.bf16.msra.mxu0 %v4241_v16 }
 0x1e7   : > { %1441 = vmatpush.bf16.msra.mxu1 %v4243_v20 }
 0x1e8   : > { %1467 = vmatpush.bf16.msra.mxu3 %v4244_v57 }
 0x1ea   : > { %1599 = vmatpush.bf16.msra.mxu2 %v4242_v39  ;;  %1442 = vmatmul.bf16.vlgmr.msra.gmra.mxu1 %v1269_v6 }
 0x1eb   : > { %1534 = vmatpush.bf16.msrb.mxu1 %v4245_v1  ;;  %1468 = vmatmul.bf16.vlgmr.msra.gmra.mxu3 %v1269_v6  ;;  %v4255_v1 = vld [vmem:[#allocation49_spill] sm:$0xff]  ;;  %v4258_v6 = vld [vmem:[#allocation52_spill] sm:$0xff] }
 0x1ec   : > { %1560 = vmatpush.bf16.msrb.mxu3 %v4246_v35  ;;  %v4256_v35 = vld [vmem:[#allocation65_spill] sm:$0xff] }
 0x1ee   : > { %1600 = vmatpush.bf16.msra.mxu2 %v4247_v34  ;;  %v4257_v34 = vld [vmem:[#allocation26_spill] sm:$0xff] }
 0x1ef   : > { %1535 = vmatpush.bf16.msrb.mxu1 %v4248_v45  ;;  %v4259_v45 = vld [vmem:[#allocation68_spill] sm:$0xff] }
 0x1f0   : > { %1561 = vmatpush.bf16.msrb.mxu3 %v4249_v38  ;;  %v4260_v38 = vld [vmem:[#allocation27_spill] sm:$0xff] }
 0x1f2   : > { %1601 = vmatpush.bf16.msra.mxu2 %v4250_v25  ;;  %v4261_v25 = vld [vmem:[#allocation56_spill] sm:$0xff] }
 0x1f3   : > { %1536 = vmatpush.bf16.msrb.mxu1 %v4251_v28  ;;  %v4262_v28 = vld [vmem:[#allocation71_spill] sm:$0xff] }
 0x1f4   : > { %1562 = vmatpush.bf16.msrb.mxu3 %v4252_v46  ;;  %v4263_v46 = vld [vmem:[#allocation28_spill] sm:$0xff] }
 0x1f6   : > { %1602 = vmatpush.bf16.msra.mxu2 %v4253_v62  ;;  %v4264_v62 = vld [vmem:[#allocation58_spill] sm:$0xff] }
 0x1f7   : > { %1537 = vmatpush.bf16.msrb.mxu1 %v4254_v26  ;;  %v4265_v26 = vld [vmem:[#allocation74_spill] sm:$0xff] }
 0x1f8   : > { %1563 = vmatpush.bf16.msrb.mxu3 %v4255_v1  ;;  %v4266_v1 = vld [vmem:[#allocation29_spill] sm:$0xff] }
 0x1fa   : > { %1603 = vmatpush.bf16.msra.mxu2 %v4256_v35  ;;  %v4267_v35 = vld [vmem:[#allocation30_spill] sm:$0xff] }
 0x1fb   : > { %1538 = vmatpush.bf16.msrb.mxu1 %v4257_v34  ;;  %v4268_v34 = vld [vmem:[#allocation61_spill] sm:$0xff] }
 0x1fc   : > { %1564 = vmatpush.bf16.msrb.mxu3 %v4258_v6  ;;  %v4269_v6 = vld [vmem:[#allocation63_spill] sm:$0xff] }
 0x1fe   : > { %1604 = vmatpush.bf16.msra.mxu2 %v4259_v45  ;;  %v4270_v45 = vld [vmem:[#allocation32_spill] sm:$0xff] }
 0x1ff   : > { %1539 = vmatpush.bf16.msrb.mxu1 %v4260_v38  ;;  %v4271_v38 = vld [vmem:[#allocation66_spill] sm:$0xff] }
 0x200   : > { %1565 = vmatpush.bf16.msrb.mxu3 %v4261_v25  ;;  %v4272_v25 = vld [vmem:[#allocation34_spill] sm:$0xff] }
 0x202   : > { %1605 = vmatpush.bf16.msra.mxu2 %v4262_v28  ;;  %v4273_v28 = vld [vmem:[#allocation69_spill] sm:$0xff] }
 0x203   : > { %1540 = vmatpush.bf16.msrb.mxu1 %v4263_v46  ;;  %v4274_v46 = vld [vmem:[#allocation35_spill] sm:$0xff] }
 0x204   : > { %1566 = vmatpush.bf16.msrb.mxu3 %v4264_v62  ;;  %v4275_v62 = vld [vmem:[#allocation72_spill] sm:$0xff] }
 0x206   : > { %1606 = vmatpush.bf16.msra.mxu2 %v4265_v26  ;;  %v4276_v26 = vld [vmem:[#allocation38_spill] sm:$0xff] }
 0x207   : > { %1541 = vmatpush.bf16.msrb.mxu1 %v4266_v1  ;;  %v4277_v1 = vld [vmem:[#allocation75_spill] sm:$0xff] }
 0x208   : > { %1567 = vmatpush.bf16.msrb.mxu3 %v4268_v34  ;;  %v4279_v34 = vld [vmem:[#allocation76_spill] sm:$0xff] }
 0x20b   : > { %1586 = vmatpush.bf16.msra.mxu1 %v4267_v35  ;;  %v4278_v35 = vld [vmem:[#allocation41_spill] sm:$0xff] }
 0x20c   : > { %1612 = vmatpush.bf16.msra.mxu3 %v4269_v6  ;;  %v4280_v6 = vld [vmem:[#allocation45_spill] sm:$0xff] }
 0x20f   : > { %1587 = vmatpush.bf16.msra.mxu1 %v4270_v45  ;;  %v4281_v45 = vld [vmem:[#allocation77_spill] sm:$0xff] }
 0x210   : > { %1613 = vmatpush.bf16.msra.mxu3 %v4271_v38  ;;  %v4282_v38 = vld [vmem:[#allocation50_spill] sm:$0xff] }
 0x213   : > { %1588 = vmatpush.bf16.msra.mxu1 %v4272_v25  ;;  %v4283_v25 = vld [vmem:[#allocation78_spill] sm:$0xff] }
 0x214   : > { %1614 = vmatpush.bf16.msra.mxu3 %v4273_v28 }
 0x217   : > { %1589 = vmatpush.bf16.msra.mxu1 %v4274_v46 }
 0x218   : > { %1615 = vmatpush.bf16.msra.mxu3 %v4275_v62 }
 0x21b   : > { %1590 = vmatpush.bf16.msra.mxu1 %v4276_v26 }
 0x21c   : > { %1616 = vmatpush.bf16.msra.mxu3 %v4277_v1 }
 0x21f   : > { %1591 = vmatpush.bf16.msra.mxu1 %v4278_v35 }
 0x220   : > { %1617 = vmatpush.bf16.msra.mxu3 %v4279_v34 }
 0x223   : > { %1592 = vmatpush.bf16.msra.mxu1 %v4280_v6 }
 0x224   : > { %1618 = vmatpush.bf16.msra.mxu3 %v4281_v45 }
 0x226   : > { %v1319_v28 = vpop.f32.mrf.mxu0 }
 0x227   : > { %1593 = vmatpush.bf16.msra.mxu1 %v4282_v38 }
 0x228   : > { %1619 = vmatpush.bf16.msra.mxu3 %v4283_v25 }
 0x22c   : > { %v1293_v46 = vpop.f32.mrf.mxu2 }
 0x22e   : > { %v1321_v57 = vpop.f32.mrf.mxu0 }
 0x234   : > { %v1295_v62 = vpop.f32.mrf.mxu2 }
 0x236   : > { %v1371_v20 = vpop.f32.mrf.mxu0 }
 0x23c   : > { %v1345_v26 = vpop.f32.mrf.mxu2 }
 0x23e   : > { %v1373_v39 = vpop.f32.mrf.mxu0 }
 0x244   : > { %v1347_v1 = vpop.f32.mrf.mxu2 }
 0x246   : > { %v1280_v16 = vpop.f32.mrf.mxu1 }
 0x247   : > { %v1294_v35 = vadd.f32 %v1293_v46, %v1280_v16 }
 0x249   : > { %v2400_v24 = vmul.f32 -1.442695, %v1294_v35 }
 0x24b   : > { %2577 = vpow2.f32 %v2400_v24 }
 0x24c   : > { %v1306_v34 = vpop.f32.mrf.mxu3 }
 0x24d   : > { %v1320_v6 = vadd.f32 %v1319_v28, %v1306_v34 }
 0x24e   : > { %v1456_v40 = vpop.f32.mrf.mxu2  ;;  %v1282_v45 = vpop.f32.mrf.mxu1 }
 0x24f   : > { %v2401_v10 = vmul.f32 -1.442695, %v1320_v6  ;;  %v4284_v6 = vld [vmem:[#allocation54_spill] sm:$0xff] }
 0x251   : > { %v2578_v38 = vpop.eup %2577  ;;  %2579 = vpow2.f32 %v2401_v10  ;;  %v1493_v10 = vadd.f32 %v1456_v40, %v4284_v6 }
 0x252   : > { %v1378_v25 = vadd.f32 1.0, %v2578_v38 }
 0x253   : > { %v2403_v2 = vmul.f32 -1.442695, %v1493_v10 }
 0x254   : > { %2581 = vrcp.f32 %v1378_v25  ;;  %v1308_v54 = vpop.f32.mrf.mxu3  ;;  %v1390_v24 = vand.u32 2147483648, %v1378_v25  ;;  %v1388_v45 = vand.u32 2147483647, %v1378_v25  ;;  %vm1384_vm12 = vweird.f32 %v1378_v25 }
 0x256   : > { %v1458_v57 = vpop.f32.mrf.mxu2  ;;  %v1332_v62 = vpop.f32.mrf.mxu1  ;;  %v1391_v54 = vor.u32 1.1754944e-38, %v1390_v24  ;;  %vm1389_vm14 = vcmp.eq.f32.partialorder %v1388_v45, 8.507059e+37 }
 0x257   : > { %v2580_v9 = vpop.eup %2579  ;;  %v1346_v44 = vadd.f32 %v1345_v26, %v1332_v62 }
 0x258   : > { %v1397_v31 = vadd.f32 1.0, %v2580_v9 }
 0x25a   : > { %v2582_v39 = vpop.eup %2581  ;;  %2583 = vrcp.f32 %v1397_v31  ;;  %v1409_v24 = vand.u32 2147483648, %v1397_v31  ;;  %vm1403_vm0 = vweird.f32 %v1397_v31 }
 0x25b   : > { %v1380_v1 = vmul.f32 %v2582_v39, %v1378_v25  ;;  %vm1385_vm11 = vweird.f32 %v2582_v39  ;;  %2585 = vpow2.f32 %v2403_v2 }
 0x25c   : > { %v1358_v16 = vpop.f32.mrf.mxu3  ;;  %vm1386_vm13 = vmor %vm1384_vm12, %vm1385_vm11  ;;  %v1410_v62 = vor.u32 1.1754944e-38, %v1409_v24 }
 0x25d   : > { %v1381_v35 = vsub.f32 1.0, %v1380_v1  ;;  %v1372_v9 = vadd.f32 %v1371_v20, %v1358_v16 }
 0x25e   : > { %v1334_v46 = vpop.f32.mrf.mxu1 }
 0x25f   : > { %v1382_v34 = vmul.f32 %v2582_v39, %v1381_v35 }
 0x260   : > { %v2584_v28 = vpop.eup %2583 }
 0x261   : > { %v1399_v38 = vmul.f32 %v2584_v28, %v1397_v31  ;;  %v1383_v56 = vadd.f32 %v2582_v39, %v1382_v34  ;;  %vm1404_vm15 = vweird.f32 %v2584_v28 }
 0x262   : > { %vm1405_vm1 = vmor %vm1403_vm0, %vm1404_vm15 }
 0x263   : > { %v1400_v57 = vsub.f32 1.0, %v1399_v38  ;;  %v1387_v36 = vsel %vm1386_vm13, %v2582_v39, %v1383_v56  ;;  %v1407_v56 = vand.u32 2147483647, %v1397_v31 }
 0x264   : > { %v1392_v19 = vsel %vm1389_vm14, %v1391_v54, %v1387_v36  ;;  %v1360_v1 = vpop.f32.mrf.mxu3  ;;  %v2586_v36 = vpop.eup %2585 }
 0x265   : > { %v1413_v46 = vmul.f32 %v1392_v19, %v1372_v9  ;;  %v1401_v22 = vmul.f32 %v2584_v28, %v1400_v57  ;;  %vm1408_vm2 = vcmp.eq.f32.partialorder %v1407_v56, 8.507059e+37  ;;  %v1497_v2 = vadd.f32 1.0, %v2586_v36 }
 0x267   : > { %v1443_v35 = vpop.f32.mrf.mxu1  ;;  %v1414_v3 = vadd.f32 %v1413_v46, %v1346_v44  ;;  %v1402_v25 = vadd.f32 %v2584_v28, %v1401_v22  ;;  %vm1503_vm8 = vweird.f32 %v1497_v2 }
 0x268   : > { %v1473_v30 = vadd.f32 %v1443_v35, %v4285_v5 }
 0x269   : > { %2587 = vtanh.f32 %v1414_v3  ;;  %v1406_v26 = vsel %vm1405_vm1, %v2584_v28, %v1402_v25 }
 0x26a   : > { %v2402_v40 = vmul.f32 -1.442695, %v1473_v30  ;;  %v1411_v3 = vsel %vm1408_vm2, %v1410_v62, %v1406_v26  ;;  %v4307_v26 = vld [vmem:[#allocation36_spill] sm:$0xff]  ;;  %v4309_v62 = vld [vmem:[#allocation21_spill] sm:$0xff] }
 0x26c   : > { %2589 = vpow2.f32 %v2402_v40 }
 0x26e   : > { %v1469_v20 = vpop.f32.mrf.mxu3 }
 0x26f   : > { %v1445_v39 = vpop.f32.mrf.mxu1  ;;  %v2588_v19 = vpop.eup %2587 }
 0x270   : > { %v1416_v44 = vsub.f32 %v3737_v29, %v2588_v19 }
 0x272   : > { %v2590_v5 = vpop.eup %2589  ;;  %v1417_v22 = vmul.f32 %v1416_v44, %v1411_v3  ;;  %v4310_v44 = vld [vmem:[#allocation40_spill] sm:$0xff]  ;;  %v4313_v3 = vld [vmem:[#allocation43_spill] sm:$0xff] }
 0x273   : > { %v1477_v30 = vadd.f32 1.0, %v2590_v5  ;;  %v4311_v5 = vld [vmem:[#allocation59_spill] sm:$0xff] }
 0x274   : > { %v3842_v16 = vadd.f32 %v2588_v19, %v1417_v22  ;;  %v4308_v19 = vld [vmem:[#allocation57_spill] sm:$0xff] }
 0x275   : > { %2591 = vrcp.f32 %v1477_v30  ;;  %v1489_v54 = vand.u32 2147483648, %v1477_v30  ;;  %v1487_v9 = vand.u32 2147483647, %v1477_v30  ;;  %vm1483_vm4 = vweird.f32 %v1477_v30  ;;  %v4315_v22 = vld [vmem:[#allocation25_spill] sm:$0xff] }
 0x276   : > { %2593 = vrcp.f32 %v1497_v2  ;;  %v1471_v31 = vpop.f32.mrf.mxu3  ;;  %v1520_v34 = vpack.c.bf16 %v3842_v16, %v3842_v16 }
 0x277   : > { %v1490_v35 = vor.u32 1.1754944e-38, %v1489_v54  ;;  %vm1488_vm6 = vcmp.eq.f32.partialorder %v1487_v9, 8.507059e+37  ;;  %v4316_v31 = vld [vmem:[#allocation49_spill] sm:$0xff]  ;;  %v4323_v54 = vld [vmem:[#allocation71_spill] sm:$0xff]  ;;  %v4325_v9 = vld [vmem:[#allocation58_spill] sm:$0xff] }
 0x278   : > { %1542 = vmatmul.bf16.vlgmr.msrb.gmra.mxu1 %v1520_v34  ;;  %1568 = vmatmul.bf16.vlgmr.msrb.gmra.mxu3 %v1520_v34 }
 0x279   : > { %1697 = vmatpush.bf16.msrb.mxu1 %v4226_v47  ;;  %1771 = vmatpush.bf16.msrb.mxu3 %v3098_v11 }
 0x27b   : > { %v2592_v45 = vpop.eup %2591 }
 0x27c   : > { %v2594_v28 = vpop.eup %2593  ;;  %v1479_v6 = vmul.f32 %v2592_v45, %v1477_v30  ;;  %vm1484_vm3 = vweird.f32 %v2592_v45  ;;  %v4314_v30 = vld [vmem:[#allocation62_spill] sm:$0xff] }
 0x27d   : > { %v1499_v38 = vmul.f32 %v2594_v28, %v1497_v2  ;;  %1698 = vmatpush.bf16.msrb.mxu1 %v4227_v0  ;;  %1772 = vmatpush.bf16.msrb.mxu3 %v3123_v32  ;;  %vm1485_vm5 = vmor %vm1483_vm4, %vm1484_vm3  ;;  %v4286_v32 = vld [vmem:[#allocation79_spill] sm:$0xff]  ;;  %vm1504_vm7 = vweird.f32 %v2594_v28 }
 0x27e   : > { %v1480_v10 = vsub.f32 1.0, %v1479_v6  ;;  %vm1505_vm9 = vmor %vm1503_vm8, %vm1504_vm7  ;;  %v4320_v6 = vld [vmem:[#allocation68_spill] sm:$0xff] }
 0x27f   : > { %v1500_v46 = vsub.f32 1.0, %v1499_v38  ;;  %v4322_v38 = vld [vmem:[#allocation56_spill] sm:$0xff] }
 0x280   : > { %v1481_v57 = vmul.f32 %v2592_v45, %v1480_v10  ;;  %v4321_v10 = vld [vmem:[#allocation27_spill] sm:$0xff] }
 0x281   : > { %1699 = vmatpush.bf16.msrb.mxu1 %v4228_v27  ;;  %1773 = vmatpush.bf16.msrb.mxu3 %v3154_v51  ;;  %v1501_v25 = vmul.f32 %v2594_v28, %v1500_v46  ;;  %v1509_v51 = vand.u32 2147483648, %v1497_v2  ;;  %v1507_v27 = vand.u32 2147483647, %v1497_v2  ;;  %v4312_v2 = vld [vmem:[#allocation24_spill] sm:$0xff]  ;;  %v4327_v46 = vld [vmem:[#allocation29_spill] sm:$0xff] }
 0x282   : > { %v1482_v1 = vadd.f32 %v2592_v45, %v1481_v57  ;;  %v4324_v57 = vld [vmem:[#allocation28_spill] sm:$0xff] }
 0x283   : > { %v1502_v24 = vadd.f32 %v2594_v28, %v1501_v25  ;;  %vm1508_vm10 = vcmp.eq.f32.partialorder %v1507_v27, 8.507059e+37  ;;  %v4332_v25 = vld [vmem:[#allocation66_spill] sm:$0xff] }
 0x284   : > { %v1486_v11 = vsel %vm1485_vm5, %v2592_v45, %v1482_v1  ;;  %v4318_v45 = vld [vmem:[#allocation26_spill] sm:$0xff] }
 0x285   : > { %v1491_v47 = vsel %vm1488_vm6, %v1490_v35, %v1486_v11  ;;  %1700 = vmatpush.bf16.msrb.mxu1 %v4229_v63  ;;  %1774 = vmatpush.bf16.msrb.mxu3 %v3181_v7  ;;  %v1506_v56 = vsel %vm1505_vm9, %v2594_v28, %v1502_v24  ;;  %v1510_v63 = vor.u32 1.1754944e-38, %v1509_v51  ;;  %v4319_v28 = vld [vmem:[#allocation52_spill] sm:$0xff]  ;;  %v4326_v1 = vld [vmem:[#allocation74_spill] sm:$0xff]  ;;  %v4328_v35 = vld [vmem:[#allocation61_spill] sm:$0xff] }
 0x286   : > { %v1513_v40 = vmul.f32 %v1491_v47, %v1469_v20  ;;  %v4329_v11 = vld [vmem:[#allocation30_spill] sm:$0xff]  ;;  %v4330_v47 = vld [vmem:[#allocation63_spill] sm:$0xff]  ;;  %v4336_v51 = vld [vmem:[#allocation72_spill] sm:$0xff] }
 0x287   : > { %v1511_v36 = vsel %vm1508_vm10, %v1510_v63, %v1506_v56  ;;  %v4335_v24 = vld [vmem:[#allocation35_spill] sm:$0xff]  ;;  %v4337_v27 = vld [vmem:[#allocation38_spill] sm:$0xff]  ;;  %v4340_v63 = vld [vmem:[#allocation76_spill] sm:$0xff] }
 0x288   : > { %v1514_v0 = vadd.f32 %v1513_v40, %v4286_v32  ;;  %1594 = vmatmul.bf16.vlgmr.msra.gmra.mxu1 %v1520_v34  ;;  %1620 = vmatmul.bf16.vlgmr.msra.gmra.mxu3 %v1520_v34  ;;  %v4317_v34 = vld [vmem:[#allocation65_spill] sm:$0xff]  ;;  %v4331_v40 = vld [vmem:[#allocation32_spill] sm:$0xff]  ;;  %v4333_v32 = vld [vmem:[#allocation34_spill] sm:$0xff] }
 0x289   : > { %1701 = vmatpush.bf16.msrb.mxu1 %v4230_v23  ;;  %1775 = vmatpush.bf16.msrb.mxu3 %v3221_v53  ;;  %v4338_v56 = vld [vmem:[#allocation75_spill] sm:$0xff] }
 0x28a   : > { %2595 = vtanh.f32 %v1514_v0  ;;  %v4334_v0 = vld [vmem:[#allocation69_spill] sm:$0xff] }
 0x28d   : > { %1702 = vmatpush.bf16.msrb.mxu1 %v4231_v13  ;;  %1776 = vmatpush.bf16.msrb.mxu3 %v3257_v49  ;;  %v1670_v49 = vstv %s1669_s30  ;;  %v4301_v13 = vld [vmem:[#allocation51_spill] sm:$0xff] }
 0x28e   : > { %vm1671_vm11 = vcmp.eq.s32.totalorder %v3652_v17, %v1670_v49  ;;  %v4300_v17 = vld [vmem:[#allocation22_spill] sm:$0xff] }
 0x290   : > { %v2596_v7 = vpop.eup %2595 }
 0x291   : > { %v1516_v20 = vsub.f32 %v3758_v55, %v2596_v7  ;;  %1703 = vmatpush.bf16.msrb.mxu1 %v4232_v43  ;;  %1777 = vmatpush.bf16.msrb.mxu3 %v3297_v58  ;;  %v1672_v58 = vsel %vm1671_vm11, 1, %v4235_v41  ;;  %v4302_v43 = vld [vmem:[#allocation73_spill] sm:$0xff]  ;;  %v4303_v55 = vld [vmem:[#allocation55_spill] sm:$0xff] }
 0x292   : > { %1674 = vperm.xlu1 %2546, %v1672_v58  }
 0x293   : > { %v1517_v39 = vmul.f32 %v1516_v20, %v1511_v36  ;;  %v4341_v20 = vld [vmem:[#allocation45_spill] sm:$0xff] }
 0x294   : > { %v4342_v36 = vld [vmem:[#allocation77_spill] sm:$0xff] }
 0x295   : > { %v3862_v53 = vadd.f32 %v2596_v7, %v1517_v39  ;;  %1704 = vmatpush.bf16.msrb.mxu1 %v4233_v50  ;;  %1778 = vmatpush.bf16.msrb.mxu3 %v3340_v33  ;;  %v4297_v33 = vld [vmem:[#allocation48_spill] sm:$0xff]  ;;  %v4339_v7 = vld [vmem:[#allocation41_spill] sm:$0xff]  ;;  %v4343_v39 = vld [vmem:[#allocation50_spill] sm:$0xff] }
 0x296   : > { %v4304_v50 = vld [vmem:[#allocation16_spill] sm:$0xff] }
 0x297   : > { %v1519_v23 = vpack.c.bf16 %v3862_v53, %v3862_v53 }
 0x299   : > { %1797 = vmatpush.bf16.msra.mxu1 %v4234_v12  ;;  %1823 = vmatpush.bf16.msra.mxu3 %v3368_v42  ;;  %v4298_v42 = vld [vmem:[#allocation70_spill] sm:$0xff]  ;;  %v4305_v12 = vld [vmem:[#allocation23_spill] sm:$0xff] }
 0x29a   : > { %1529 = vmatmul.bf16.vlgmr.msrb.gmra.mxu0 %v1519_v23  ;;  %1555 = vmatmul.bf16.vlgmr.msrb.gmra.mxu2 %v1519_v23 }
 0x29b   : > { %1705 = vmatmul.bf16.vlgmr.msrb.gmra.mxu1 %v1519_v23  ;;  %1684 = vmatpush.bf16.msrb.mxu0 %v2764_v8  ;;  %v4287_v8 = vld [vmem:[#allocation7_spill] sm:$0xff] }
 0x29c   : > { %1710 = vmatpush.bf16.msrb.mxu2 %v2847_v37  ;;  %v4288_v37 = vld [vmem:[#allocation14_spill] sm:$0xff] }
 0x29d   : > { %1798 = vmatpush.bf16.msra.mxu1 %v4236_v52  ;;  %1824 = vmatpush.bf16.msra.mxu3 %v3402_v61  ;;  %v4289_v61 = vld [vmem:[#allocation39_spill] sm:$0xff]  ;;  %v4306_v52 = vld [vmem:[#allocation18_spill] sm:$0xff] }
 0x29f   : > { %1685 = vmatpush.bf16.msrb.mxu0 %v2781_v14  ;;  %v4290_v14 = vld [vmem:[#allocation64_spill] sm:$0xff] }
 0x2a0   : > { %1711 = vmatpush.bf16.msrb.mxu2 %v2878_v48  ;;  %v4291_v48 = vld [vmem:[#allocation9_spill] sm:$0xff] }
 0x2a1   : > { %1799 = vmatpush.bf16.msra.mxu1 %v3165_v59  ;;  %1825 = vmatpush.bf16.msra.mxu3 %v3430_v4  ;;  %v4292_v4 = vld [vmem:[#allocation17_spill] sm:$0xff]  ;;  %v4295_v59 = vld [vmem:[#allocation11_spill] sm:$0xff] }
 0x2a3   : > { %1686 = vmatpush.bf16.msrb.mxu0 %v2803_v21  ;;  %v4293_v21 = vld [vmem:[#allocation42_spill] sm:$0xff] }
 0x2a4   : > { %1712 = vmatpush.bf16.msrb.mxu2 %v2910_v60  ;;  %v4294_v60 = vld [vmem:[#allocation67_spill] sm:$0xff] }
 0x2a5   : > { %1800 = vmatpush.bf16.msra.mxu1 %v3192_v18  ;;  %1826 = vmatpush.bf16.msra.mxu3 %v3459_v15  ;;  %v4296_v18 = vld [vmem:[#allocation20_spill] sm:$0xff]  ;;  %v4299_v15 = vld [vmem:[#allocation13_spill] sm:$0xff] }
 0x2a7   : > { %1687 = vmatpush.bf16.msrb.mxu0 %v4287_v8 }
 0x2a8   : > { %1713 = vmatpush.bf16.msrb.mxu2 %v4288_v37 }
 0x2a9   : > { %1801 = vmatpush.bf16.msra.mxu1 %v4289_v61  ;;  %1827 = vmatpush.bf16.msra.mxu3 %v4290_v14 }
 0x2aa   : > { %1581 = vmatmul.bf16.vlgmr.msra.gmra.mxu0 %v1519_v23  ;;  %1607 = vmatmul.bf16.vlgmr.msra.gmra.mxu2 %v1519_v23 }
 0x2ab   : > { %1688 = vmatpush.bf16.msrb.mxu0 %v4291_v48 }
 0x2ac   : > { %1714 = vmatpush.bf16.msrb.mxu2 %v4292_v4 }
 0x2ad   : > { %1802 = vmatpush.bf16.msra.mxu1 %v4293_v21  ;;  %1828 = vmatpush.bf16.msra.mxu3 %v4294_v60 }
 0x2af   : > { %1689 = vmatpush.bf16.msrb.mxu0 %v4295_v59 }
 0x2b0   : > { %1715 = vmatpush.bf16.msrb.mxu2 %v4296_v18 }
 0x2b1   : > { %1803 = vmatpush.bf16.msra.mxu1 %v4297_v33  ;;  %1829 = vmatpush.bf16.msra.mxu3 %v4298_v42 }
 0x2b3   : > { %1690 = vmatpush.bf16.msrb.mxu0 %v4299_v15 }
 0x2b4   : > { %1716 = vmatpush.bf16.msrb.mxu2 %v4300_v17 }
 0x2b5   : > { %1804 = vmatpush.bf16.msra.mxu1 %v4301_v13  ;;  %1830 = vmatpush.bf16.msra.mxu3 %v4302_v43 }
 0x2b7   : > { %1691 = vmatpush.bf16.msrb.mxu0 %v4304_v50 }
 0x2b8   : > { %1717 = vmatpush.bf16.msrb.mxu2 %v4305_v12 }
 0x2b9   : > { %1849 = vmatpush.bf16.msrb.mxu1 %v4303_v55 }
 0x2ba   : > { %1692 = vmatmul.bf16.vlgmr.msrb.gmra.mxu0 %v1519_v23 }
 0x2bb   : > { %1784 = vmatpush.bf16.msra.mxu0 %v4306_v52  ;;  %1718 = vmatmul.bf16.vlgmr.msrb.gmra.mxu2 %v1519_v23  ;;  %v4344_v23 = vld [vmem:[#allocation78_spill] sm:$0xff] }
 0x2bc   : > { %1810 = vmatpush.bf16.msra.mxu2 %v4307_v26 }
 0x2bd   : > { %1850 = vmatpush.bf16.msrb.mxu1 %v4308_v19 }
 0x2bf   : > { %1785 = vmatpush.bf16.msra.mxu0 %v4309_v62 }
 0x2c0   : > { %1811 = vmatpush.bf16.msra.mxu2 %v4310_v44 }
 0x2c1   : > { %1851 = vmatpush.bf16.msrb.mxu1 %v4311_v5 }
 0x2c3   : > { %1786 = vmatpush.bf16.msra.mxu0 %v4312_v2 }
 0x2c4   : > { %1812 = vmatpush.bf16.msra.mxu2 %v4313_v3 }
 0x2c5   : > { %1852 = vmatpush.bf16.msrb.mxu1 %v4314_v30 }
 0x2c7   : > { %1787 = vmatpush.bf16.msra.mxu0 %v4315_v22 }
 0x2c8   : > { %1813 = vmatpush.bf16.msra.mxu2 %v4316_v31 }
 0x2c9   : > { %1853 = vmatpush.bf16.msrb.mxu1 %v4317_v34  ;;  %v4345_v34 = vld [vmem:[#allocation60_spill] sm:$0xff] }
 0x2cb   : > { %1788 = vmatpush.bf16.msra.mxu0 %v4318_v45 }
 0x2cc   : > { %1814 = vmatpush.bf16.msra.mxu2 %v4319_v28 }
 0x2cd   : > { %1854 = vmatpush.bf16.msrb.mxu1 %v4320_v6 }
 0x2cf   : > { %1789 = vmatpush.bf16.msra.mxu0 %v4321_v10 }
 0x2d0   : > { %1815 = vmatpush.bf16.msra.mxu2 %v4322_v38 }
 0x2d1   : > { %1855 = vmatpush.bf16.msrb.mxu1 %v4323_v54 }
 0x2d3   : > { %1790 = vmatpush.bf16.msra.mxu0 %v4324_v57 }
 0x2d4   : > { %1816 = vmatpush.bf16.msra.mxu2 %v4325_v9 }
 0x2d5   : > { %1856 = vmatpush.bf16.msrb.mxu1 %v4326_v1 }
 0x2d7   : > { %1791 = vmatpush.bf16.msra.mxu0 %v4327_v46 }
 0x2d8   : > { %1817 = vmatpush.bf16.msra.mxu2 %v4328_v35 }
 0x2db   : > { %1836 = vmatpush.bf16.msrb.mxu0 %v4329_v11 }
 0x2dc   : > { %1862 = vmatpush.bf16.msrb.mxu2 %v4330_v47 }
 0x2df   : > { %1837 = vmatpush.bf16.msrb.mxu0 %v4331_v40 }
 0x2e0   : > { %1863 = vmatpush.bf16.msrb.mxu2 %v4332_v25 }
 0x2e3   : > { %1838 = vmatpush.bf16.msrb.mxu0 %v4333_v32  ;;  %v4346_v32 = vld [vmem:[#allocation53_spill] sm:$0xff] }
 0x2e4   : > { %1864 = vmatpush.bf16.msrb.mxu2 %v4334_v0 }
 0x2e7   : > { %1839 = vmatpush.bf16.msrb.mxu0 %v4335_v24 }
 0x2e8   : > { %1865 = vmatpush.bf16.msrb.mxu2 %v4336_v51 }
 0x2eb   : > { %1840 = vmatpush.bf16.msrb.mxu0 %v4337_v27 }
 0x2ec   : > { %1866 = vmatpush.bf16.msrb.mxu2 %v4338_v56 }
 0x2ef   : > { %1841 = vmatpush.bf16.msrb.mxu0 %v4339_v7 }
 0x2f0   : > { %1867 = vmatpush.bf16.msrb.mxu2 %v4340_v63 }
 0x2f3   : > { %1842 = vmatpush.bf16.msrb.mxu0 %v4341_v20 }
 0x2f4   : > { %1868 = vmatpush.bf16.msrb.mxu2 %v4342_v36 }
 0x2f5   : > { %v1543_v49 = vpop.f32.mrf.mxu1 }
 0x2f7   : > { %1843 = vmatpush.bf16.msrb.mxu0 %v4343_v39 }
 0x2f8   : > { %1869 = vmatpush.bf16.msrb.mxu2 %v4344_v23 }
 0x2fb   : > { %v1569_v58 = vpop.f32.mrf.mxu3 }
 0x2fd   : > { %v1545_v8 = vpop.f32.mrf.mxu1 }
 0x303   : > { %v1571_v37 = vpop.f32.mrf.mxu3 }
 0x305   : > { %v1595_v61 = vpop.f32.mrf.mxu1 }
 0x30b   : > { %v1621_v14 = vpop.f32.mrf.mxu3 }
 0x30d   : > { %v1597_v48 = vpop.f32.mrf.mxu1 }
 0x313   : > { %v1623_v4 = vpop.f32.mrf.mxu3 }
 0x317   : > { %v1530_v21 = vpop.f32.mrf.mxu0 }
 0x318   : > { %v1544_v60 = vadd.f32 %v1543_v49, %v1530_v21  ;;  %v1706_v59 = vpop.f32.mrf.mxu1 }
 0x319   : > { %v1743_v45 = vadd.f32 %v1706_v59, %v4345_v34 }
 0x31a   : > { %v2404_v18 = vmul.f32 -1.442695, %v1544_v60 }
 0x31b   : > { %v2407_v9 = vmul.f32 -1.442695, %v1743_v45 }
 0x31c   : > { %2597 = vpow2.f32 %v2404_v18 }
 0x31d   : > { %v1556_v33 = vpop.f32.mrf.mxu2 }
 0x31e   : > { %v1570_v42 = vadd.f32 %v1569_v58, %v1556_v33 }
 0x31f   : > { %v1532_v15 = vpop.f32.mrf.mxu0 }
 0x320   : > { %v2405_v17 = vmul.f32 -1.442695, %v1570_v42  ;;  %v1708_v13 = vpop.f32.mrf.mxu1 }
 0x322   : > { %v2598_v43 = vpop.eup %2597  ;;  %2599 = vpow2.f32 %v2405_v17 }
 0x323   : > { %v1628_v55 = vadd.f32 1.0, %v2598_v43 }
 0x325   : > { %2601 = vrcp.f32 %v1628_v55  ;;  %v1558_v50 = vpop.f32.mrf.mxu2  ;;  %v1640_v2 = vand.u32 2147483648, %v1628_v55  ;;  %v1638_v22 = vand.u32 2147483647, %v1628_v55  ;;  %vm1634_vm13 = vweird.f32 %v1628_v55 }
 0x327   : > { %v1582_v12 = vpop.f32.mrf.mxu0  ;;  %v1641_v10 = vor.u32 1.1754944e-38, %v1640_v2  ;;  %vm1639_vm15 = vcmp.eq.f32.partialorder %v1638_v22, 8.507059e+37  ;;  %v2627_v2 = vld [vmem:[%s2736_s6] sm:$0xff] }
 0x328   : > { %v2600_v52 = vpop.eup %2599  ;;  %v1596_v35 = vadd.f32 %v1595_v61, %v1582_v12 }
 0x329   : > { %v1647_v26 = vadd.f32 1.0, %v2600_v52 }
 0x32b   : > { %v2602_v19 = vpop.eup %2601  ;;  %2603 = vrcp.f32 %v1647_v26  ;;  %v1659_v27 = vand.u32 2147483648, %v1647_v26  ;;  %vm1653_vm1 = vweird.f32 %v1647_v26  ;;  %v1657_v56 = vand.u32 2147483647, %v1647_v26 }
 0x32c   : > { %v1630_v62 = vmul.f32 %v2602_v19, %v1628_v55  ;;  %vm1635_vm12 = vweird.f32 %v2602_v19  ;;  %2605 = vpow2.f32 %v2407_v9 }
 0x32d   : > { %v1608_v44 = vpop.f32.mrf.mxu2  ;;  %vm1636_vm14 = vmor %vm1634_vm13, %vm1635_vm12  ;;  %v1660_v23 = vor.u32 1.1754944e-38, %v1659_v27  ;;  %vm1658_vm3 = vcmp.eq.f32.partialorder %v1657_v56, 8.507059e+37 }
 0x32e   : > { %v1631_v5 = vsub.f32 1.0, %v1630_v62  ;;  %v1622_v54 = vadd.f32 %v1621_v14, %v1608_v44  ;;  %v4347_v62 = vld [vmem:[#allocation80_spill] sm:$0xff] }
 0x32f   : > { %v1584_v3 = vpop.f32.mrf.mxu0 }
 0x330   : > { %v1632_v30 = vmul.f32 %v2602_v19, %v1631_v5  ;;  %v1920_v5 = vstv %s1919_s7 }
 0x331   : > { %v2604_v31 = vpop.eup %2603  ;;  %vm1921_vm8 = vcmp.eq.s32.totalorder %v2627_v2, %v1920_v5 }
 0x332   : > { %v1649_v28 = vmul.f32 %v2604_v31, %v1647_v26  ;;  %v1633_v6 = vadd.f32 %v2602_v19, %v1632_v30  ;;  %vm1654_vm0 = vweird.f32 %v2604_v31  ;;  %v2606_v63 = vpop.eup %2605  ;;  %v1922_v30 = vsel %vm1921_vm8, 1, %v4235_v41 }
 0x333   : > { %vm1655_vm2 = vmor %vm1653_vm1, %vm1654_vm0  ;;  %v1747_v8 = vadd.f32 1.0, %v2606_v63  ;;  %1924 = vperm.xlu1 %2546, %v1922_v30  }
 0x334   : > { %v1650_v38 = vsub.f32 1.0, %v1649_v28  ;;  %v1637_v57 = vsel %vm1636_vm14, %v2602_v19, %v1633_v6 }
 0x335   : > { %v1642_v1 = vsel %vm1639_vm15, %v1641_v10, %v1637_v57  ;;  %v1610_v46 = vpop.f32.mrf.mxu2  ;;  %v1759_v22 = vand.u32 2147483648, %v1747_v8  ;;  %vm1753_vm10 = vweird.f32 %v1747_v8 }
 0x336   : > { %v1663_v11 = vmul.f32 %v1642_v1, %v1622_v54  ;;  %v1651_v47 = vmul.f32 %v2604_v31, %v1650_v38 }
 0x337   : > { %v1693_v40 = vpop.f32.mrf.mxu0  ;;  %v1760_v28 = vor.u32 1.1754944e-38, %v1759_v22  ;;  %v383_v22 = vld [vmem:[%s2741_s9] sm:$0xff] }
 0x338   : > { %v1664_v25 = vadd.f32 %v1663_v11, %v1596_v35  ;;  %v1723_v0 = vadd.f32 %v1693_v40, %v4346_v32  ;;  %v1652_v51 = vadd.f32 %v2604_v31, %v1651_v47 }
 0x33a   : > { %2607 = vtanh.f32 %v1664_v25  ;;  %v2406_v24 = vmul.f32 -1.442695, %v1723_v0  ;;  %v1656_v36 = vsel %vm1655_vm2, %v2604_v31, %v1652_v51  ;;  %v1757_v31 = vand.u32 2147483647, %v1747_v8 }
 0x33b   : > { %v1661_v37 = vsel %vm1658_vm3, %v1660_v23, %v1656_v36 }
 0x33c   : > { %2609 = vpow2.f32 %v2406_v24  ;;  %vm1758_vm12 = vcmp.eq.f32.partialorder %v1757_v31, 8.507059e+37 }
 0x33e   : > { %v1719_v7 = vpop.f32.mrf.mxu2 }
 0x33f   : > { %v1695_v20 = vpop.f32.mrf.mxu0 }
 0x340   : > { %v2608_v39 = vpop.eup %2607 }
 0x341   : > { %v1666_v49 = vsub.f32 %v3842_v16, %v2608_v39 }
 0x342   : > { %v2610_v58 = vpop.eup %2609 }
 0x343   : > { %v1727_v61 = vadd.f32 1.0, %v2610_v58  ;;  %v1667_v14 = vmul.f32 %v1666_v49, %v1661_v37 }
 0x345   : > { %2611 = vrcp.f32 %v1727_v61  ;;  %v3946_v48 = vadd.f32 %v2608_v39, %v1667_v14  ;;  %v1739_v15 = vand.u32 2147483648, %v1727_v61  ;;  %v1737_v13 = vand.u32 2147483647, %v1727_v61 }
 0x346   : > { %2613 = vrcp.f32 %v1747_v8  ;;  %v1721_v4 = vpop.f32.mrf.mxu2  ;;  %vm1733_vm5 = vweird.f32 %v1727_v61 }
 0x347   : > { %v1770_v21 = vpack.c.bf16 %v3946_v48, %v3946_v48  ;;  %v1740_v50 = vor.u32 1.1754944e-38, %v1739_v15  ;;  %vm1738_vm7 = vcmp.eq.f32.partialorder %v1737_v13, 8.507059e+37 }
 0x349   : > { %1792 = vmatmul.bf16.vlgmr.msra.gmra.mxu0 %v1770_v21  ;;  %1818 = vmatmul.bf16.vlgmr.msra.gmra.mxu2 %v1770_v21 }
 0x34b   : > { %v2612_v60 = vpop.eup %2611 }
 0x34c   : > { %v2614_v59 = vpop.eup %2613  ;;  %v1729_v18 = vmul.f32 %v2612_v60, %v1727_v61  ;;  %vm1734_vm4 = vweird.f32 %v2612_v60 }
 0x34d   : > { %v1749_v42 = vmul.f32 %v2614_v59, %v1747_v8  ;;  %vm1735_vm6 = vmor %vm1733_vm5, %vm1734_vm4  ;;  %vm1754_vm9 = vweird.f32 %v2614_v59 }
 0x34e   : > { %v1730_v33 = vsub.f32 1.0, %v1729_v18  ;;  %vm1755_vm11 = vmor %vm1753_vm10, %vm1754_vm9 }
 0x34f   : > { %v1750_v55 = vsub.f32 1.0, %v1749_v42 }
 0x350   : > { %v1731_v17 = vmul.f32 %v2612_v60, %v1730_v33 }
 0x351   : > { %v1751_v19 = vmul.f32 %v2614_v59, %v1750_v55 }
 0x352   : > { %v1732_v43 = vadd.f32 %v2612_v60, %v1731_v17 }
 0x353   : > { %v1752_v3 = vadd.f32 %v2614_v59, %v1751_v19 }
 0x354   : > { %v1736_v12 = vsel %vm1735_vm6, %v2612_v60, %v1732_v43 }
 0x355   : > { %v1741_v52 = vsel %vm1738_vm7, %v1740_v50, %v1736_v12  ;;  %v1756_v34 = vsel %vm1755_vm11, %v2614_v59, %v1752_v3  ;;  %v1175_v50 = vpop.permute.xlu0 %1174 }
 0x356   : > { %v1763_v26 = vmul.f32 %v1741_v52, %v1719_v7  ;;  %v1761_v10 = vsel %vm1758_vm12, %v1760_v28, %v1756_v34  ;;  %vm1176_vm4 = vcmp.eq.s32.totalorder %v1175_v50, 1 }
 0x358   : > { %v1764_v44 = vadd.f32 %v1763_v26, %v4347_v62  ;;  %v1675_v26 = vpop.permute.xlu1 %1674 }
 0x359   : > { %1844 = vmatmul.bf16.vlgmr.msrb.gmra.mxu0 %v1770_v21  ;;  %1870 = vmatmul.bf16.vlgmr.msrb.gmra.mxu2 %v1770_v21  ;;  %vm1676_vm7 = vcmp.eq.s32.totalorder %v1675_v26, 1 }
 0x35a   : > { %2615 = vtanh.f32 %v1764_v44 }
 0x35d   : > { %v1425_v5 = vpop.permute.xlu0 %1424 }
 0x35e   : > { %vm1426_vm6 = vcmp.eq.s32.totalorder %v1425_v5, 1 }
 0x360   : > { %v2616_v45 = vpop.eup %2615 }
 0x361   : > { %v1766_v6 = vsub.f32 %v3862_v53, %v2616_v45 }
 0x363   : > { %v1767_v38 = vmul.f32 %v1766_v6, %v1761_v10  ;;  %v1177_v6 = vsel %vm1176_vm4, %v3737_v29, %v383_v22 }
 0x364   : > { %v1427_v10 = vsel %vm1426_vm6, %v3842_v16, %v1177_v6 }
 0x365   : > { %v1768_v54 = vadd.f32 %v2616_v45, %v1767_v38 }
 0x367   : > { %v1769_v57 = vpack.c.bf16 %v1768_v54, %v1768_v54  ;;  %1928 = vst [vmem:[#allocation3] sm:$0xff] %v1768_v54  ;;  %v1677_v54 = vsel %vm1676_vm7, %v3946_v48, %v1427_v10 }
 0x369   : > { %1779 = vmatmul.bf16.vlgmr.msrb.gmra.mxu3 %v1769_v57  ;;  %1805 = vmatmul.bf16.vlgmr.msra.gmra.mxu1 %v1769_v57 }
 0x379   : > { %1831 = vmatmul.bf16.vlgmr.msra.gmra.mxu3 %v1769_v57  ;;  %1857 = vmatmul.bf16.vlgmr.msrb.gmra.mxu1 %v1769_v57 }
 0x3a5   : > { %v1925_v45 = vpop.permute.xlu1 %1924 }
 0x3a6   : > { %vm1926_vm8 = vcmp.eq.s32.totalorder %v1925_v45, 1 }
 0x3c6   : > { %v1793_v41 = vpop.f32.mrf.mxu0 }
 0x3cc   : > { %v1819_v9 = vpop.f32.mrf.mxu2 }
 0x3ce   : > { %v1795_v1 = vpop.f32.mrf.mxu0 }
 0x3d4   : > { %v1821_v46 = vpop.f32.mrf.mxu2 }
 0x3d6   : > { %v1845_v35 = vpop.f32.mrf.mxu0 }
 0x3dc   : > { %v1871_v11 = vpop.f32.mrf.mxu2 }
 0x3de   : > { %v1847_v47 = vpop.f32.mrf.mxu0 }
 0x3e4   : > { %v1873_v40 = vpop.f32.mrf.mxu2 }
 0x3e6   : > { %v1806_v25 = vpop.f32.mrf.mxu1 }
 0x3e7   : > { %v1820_v53 = vadd.f32 %v1819_v9, %v1806_v25 }
 0x3e9   : > { %v2409_v32 = vmul.f32 -1.442695, %v1820_v53 }
 0x3eb   : > { %2617 = vpow2.f32 %v2409_v32 }
 0x3ec   : > { %v1780_v0 = vpop.f32.mrf.mxu3 }
 0x3ed   : > { %v1794_v24 = vadd.f32 %v1793_v41, %v1780_v0 }
 0x3ee   : > { %v1808_v51 = vpop.f32.mrf.mxu1 }
 0x3ef   : > { %v2408_v27 = vmul.f32 -1.442695, %v1794_v24 }
 0x3f1   : > { %2619 = vpow2.f32 %v2408_v27  ;;  %v2618_v56 = vpop.eup %2617 }
 0x3f2   : > { %v1897_v36 = vadd.f32 1.0, %v2618_v56 }
 0x3f4   : > { %v1782_v7 = vpop.f32.mrf.mxu3  ;;  %v1909_v62 = vand.u32 2147483648, %v1897_v36  ;;  %vm1903_vm2 = vweird.f32 %v1897_v36  ;;  %v1907_v44 = vand.u32 2147483647, %v1897_v36 }
 0x3f6   : > { %v1858_v63 = vpop.f32.mrf.mxu1  ;;  %v1910_v30 = vor.u32 1.1754944e-38, %v1909_v62  ;;  %vm1908_vm5 = vcmp.eq.f32.partialorder %v1907_v44, 8.507059e+37 }
 0x3f7   : > { %v2620_v20 = vpop.eup %2619  ;;  %v1872_v15 = vadd.f32 %v1871_v11, %v1858_v63 }
 0x3f8   : > { %v1878_v39 = vadd.f32 1.0, %v2620_v20 }
 0x3fa   : > { %2621 = vrcp.f32 %v1878_v39  ;;  %v1890_v4 = vand.u32 2147483648, %v1878_v39  ;;  %v1888_v59 = vand.u32 2147483647, %v1878_v39  ;;  %vm1884_vm14 = vweird.f32 %v1878_v39 }
 0x3fb   : > { %2623 = vrcp.f32 %v1897_v36 }
 0x3fc   : > { %v1832_v23 = vpop.f32.mrf.mxu3  ;;  %v1891_v42 = vor.u32 1.1754944e-38, %v1890_v4  ;;  %vm1889_vm0 = vcmp.eq.f32.partialorder %v1888_v59, 8.507059e+37 }
 0x3fd   : > { %v1846_v55 = vadd.f32 %v1845_v35, %v1832_v23 }
 0x3fe   : > { %v1860_v49 = vpop.f32.mrf.mxu1 }
 0x400   : > { %v2622_v58 = vpop.eup %2621 }
 0x401   : > { %v2624_v8 = vpop.eup %2623  ;;  %v1880_v37 = vmul.f32 %v2622_v58, %v1878_v39  ;;  %vm1885_vm13 = vweird.f32 %v2622_v58 }
 0x402   : > { %v1899_v14 = vmul.f32 %v2624_v8, %v1897_v36  ;;  %vm1886_vm15 = vmor %vm1884_vm14, %vm1885_vm13  ;;  %vm1904_vm1 = vweird.f32 %v2624_v8 }
 0x403   : > { %v1881_v61 = vsub.f32 1.0, %v1880_v37  ;;  %vm1905_vm3 = vmor %vm1903_vm2, %vm1904_vm1 }
 0x404   : > { %v1834_v21 = vpop.f32.mrf.mxu3  ;;  %v1900_v33 = vsub.f32 1.0, %v1899_v14 }
 0x405   : > { %v1882_v60 = vmul.f32 %v2622_v58, %v1881_v61 }
 0x406   : > { %v1901_v12 = vmul.f32 %v2624_v8, %v1900_v33 }
 0x407   : > { %v1883_v18 = vadd.f32 %v2622_v58, %v1882_v60 }
 0x408   : > { %v1902_v19 = vadd.f32 %v2624_v8, %v1901_v12 }
 0x409   : > { %v1887_v17 = vsel %vm1886_vm15, %v2622_v58, %v1883_v18 }
 0x40a   : > { %v1892_v13 = vsel %vm1889_vm0, %v1891_v42, %v1887_v17  ;;  %v1906_v2 = vsel %vm1905_vm3, %v2624_v8, %v1902_v19 }
 0x40b   : > { %v1913_v43 = vmul.f32 %v1892_v13, %v1872_v15  ;;  %v1911_v34 = vsel %vm1908_vm5, %v1910_v30, %v1906_v2 }
 0x40d   : > { %v1914_v52 = vadd.f32 %v1913_v43, %v1846_v55 }
 0x40f   : > { %2625 = vtanh.f32 %v1914_v52 }
 0x415   : > { %v2626_v3 = vpop.eup %2625 }
 0x416   : > { %v1916_v31 = vsub.f32 %v3946_v48, %v2626_v3 }
 0x418   : > { %v1917_v28 = vmul.f32 %v1916_v31, %v1911_v34 }
 0x41a   : > { %v1918_v38 = vadd.f32 %v2626_v3, %v1917_v28 }
 0x41c   : > { %v1927_v57 = vsel %vm1926_vm8, %v1918_v38, %v1677_v54  ;;  %1929 = vst [vmem:[#allocation3 + $0x8] sm:$0xff] %v1918_v38 }
 0x41d   : > { %1930 = vst [vmem:[%s2741_s9] sm:$0xff] %v1927_v57 }
 0x41e PF: > { %s15_s22 = sadd.s32 1, %s2666_s22   ;;  %s4348_s18 = smov %s2658_s20 }
 0x41f   : > { %p12_p8 = scmp.ge.s32.totalorder %s15_s22, 6   ;;  %s4349_s19 = smov %s2662_s21 }
 0x420   : > { %s4350_s20 = smov %s4353_s23  ;;  %s4351_s21 = smov %s4357_s24 }
 0x421   :  { %14 = sbr.rel (!%p12_p8) target bundleno = 3 (0x3), region = 82 }

</bundles_post_ra>
